<compile_context>
chip_gen: v7x
topology: tpu7x:2x2x1
jax: 0.10.0
libtpu: 0.0.40
codegen_flags: <defaults>
</compile_context>

<pallas_src>
import functools
import math

import jax
import jax.numpy as jnp
import numpy as np
from jax.experimental import pallas as pl
from jax.experimental.pallas import tpu as pltpu


def _attn_kernel(x_ref, wqkv_ref, bqkv_ref, wd_ref, bd_ref, gamma_ref, beta_ref,
                 out_ref, *, num_heads, head_size, eps):
    TN, W, D = x_ref.shape
    H, dh = num_heads, head_size

    x = x_ref[...]                                   # (TN, W, D) f32
    x2 = x.reshape(TN * W, D)
    xb = x2.astype(jnp.bfloat16)

    # Fused Q/K/V projection: one (TN*W, D) @ (D, 3D) MXU push, f32 accumulate.
    qkv = jnp.dot(xb, wqkv_ref[...], preferred_element_type=jnp.float32)
    qkv = (qkv + bqkv_ref[...]).astype(jnp.bfloat16)  # (TN*W, 3D)

    # Stack heads along the batch axis -> single-batch-dim einsums + one softmax
    # for all heads (static slices / concats; cheap XLU work).
    def head_stack(base):
        return jnp.concatenate(
            [qkv[:, base + h * dh: base + (h + 1) * dh].reshape(TN, W, dh)
             for h in range(H)], axis=0)             # (H*TN, W, dh) bf16

    qb = head_stack(0)
    kb = head_stack(D)
    vb = head_stack(2 * D)

    scale = 1.0 / math.sqrt(dh)
    s = jnp.einsum("bqd,bkd->bqk", qb, kb,
                   preferred_element_type=jnp.float32) * scale   # (H*TN, W, W)
    s = s - jnp.max(s, axis=-1, keepdims=True)       # stable softmax (f32)
    p = jnp.exp(s)
    denom = jnp.sum(p, axis=-1, keepdims=True)
    p = p * pl.reciprocal(denom, approx=True)        # pure-EUP reciprocal
    # attn_dropout: identity (eval)

    ctx = jnp.einsum("bqk,bkd->bqd", p.astype(jnp.bfloat16), vb,
                     preferred_element_type=jnp.float32)         # (H*TN, W, dh)

    # Undo head stacking: concat heads back along lanes (head-major order,
    # matching rearrange 'b c w h1 h2 -> b c w (h1 h2)').
    ctx_all = jnp.concatenate(
        [ctx[h * TN:(h + 1) * TN] for h in range(H)], axis=-1)   # (TN, W, D)

    # Single K=D dense matmul (head-concat folded into one push).
    hidden = jnp.dot(ctx_all.reshape(TN * W, D).astype(jnp.bfloat16),
                     wd_ref[...], preferred_element_type=jnp.float32)
    hidden = hidden + bd_ref[...]
    # out_dropout: identity (eval)

    y = hidden.reshape(TN, W, D) + x                 # residual (f32)
    u = jnp.mean(y, axis=-1, keepdims=True)
    c = y - u
    var = jnp.mean(c * c, axis=-1, keepdims=True)
    yn = c * jax.lax.rsqrt(var + eps)                # rsqrt on EUP
    res = gamma_ref[...] * yn + beta_ref[...]        # (TN, W, D)

    # Lane-dense store: one relayout to (TN, W*D), one unmasked full-width vst.
    out_ref[...] = res.reshape(TN, W * D)


def pack_params(params):
    """One-time weight packing (do NOT call per forward)."""
    return {
        "wqkv": jnp.concatenate([params["wq"], params["wk"], params["wv"]],
                                axis=1).astype(jnp.bfloat16),
        "bqkv": jnp.concatenate([params["bq"], params["bk"], params["bv"]],
                                axis=1).astype(jnp.float32),
        "wd": params["wd"].astype(jnp.bfloat16),
        "bd": params["bd"].astype(jnp.float32),
        "gamma": params["gamma"].astype(jnp.float32),
        "beta": params["beta"].astype(jnp.float32),
    }


def _choose_block_n(N, W, D):
    # v5e/v6e are single-TC: splitting the grid only adds ~0.35us/step and halves
    # the MXU row fill, so default to one grid step. Split 2-way only when the
    # per-step work is large enough to amortize the step cost (pays on v7x's two
    # TCs). Independently cap the block by a VMEM budget (v7x has only 64 MiB
    # physical / 32 MiB default scoped VMEM).
    block_n = N
    if N % 2 == 0 and N * W >= 4096:
        block_n = N // 2
    vmem_budget = 8 << 20                            # conservative, fits all gens
    per_row = 2 * 2 * (W * D * 4)                    # f32 x + f32 out, double-buffered
    max_block = max(1, vmem_budget // per_row)
    while block_n > max_block and block_n % 2 == 0:
        block_n //= 2
    while N % block_n:
        block_n -= 1
    return block_n


def cov_self_attention(x, packed, num_heads, eps=1e-12, block_n=None):
    B, C, W, D = x.shape
    N = B * C
    head_size = D // num_heads
    if block_n is None:
        block_n = _choose_block_n(N, W, D)
    assert N % block_n == 0, "block_n must divide B*C"
    grid = (N // block_n,)

    xf = x.reshape(N, W, D).astype(jnp.float32)

    kern = functools.partial(_attn_kernel, num_heads=num_heads,
                             head_size=head_size, eps=eps)

    def resident(shape):
        return pl.BlockSpec(shape, lambda n, _s=shape: tuple(0 for _ in _s))

    out = pl.pallas_call(
        kern,
        out_shape=jax.ShapeDtypeStruct((N, W * D), jnp.float32),  # lane-dense
        grid=grid,
        in_specs=[
            pl.BlockSpec((block_n, W, D), lambda n: (n, 0, 0)),   # x
            resident((D, 3 * D)),                                 # wqkv (bf16)
            resident((1, 3 * D)),                                 # bqkv (f32)
            resident((D, D)),                                     # wd   (bf16)
            resident((1, D)),                                     # bd
            resident((1, D)),                                     # gamma
            resident((1, D)),                                     # beta
        ],
        out_specs=pl.BlockSpec((block_n, W * D), lambda n: (n, 0)),
        compiler_params=pltpu.CompilerParams(
            dimension_semantics=("parallel",)),
    )(xf, packed["wqkv"], packed["bqkv"], packed["wd"],
      packed["bd"], packed["gamma"], packed["beta"])
    return out.reshape(B, C, W, D)


def ref_forward(x, params, num_heads, eps=1e-12):
    """Pure-JAX f32 reference mirroring the PyTorch forward (dropout = identity)."""
    B, C, W, D = x.shape
    dh = D // num_heads
    x = x.astype(jnp.float32)
    q = x @ params["wq"] + params["bq"][0]
    k = x @ params["wk"] + params["bk"][0]
    v = x @ params["wv"] + params["bv"][0]

    def split(t):  # (B,C,W,D) -> (B,C,H,W,dh)
        return t.reshape(B, C, W, num_heads, dh).transpose(0, 1, 3, 2, 4)

    qh, kh, vh = split(q), split(k), split(v)
    scores = jnp.einsum("bchqd,bchkd->bchqk", qh, kh) / math.sqrt(dh)
    probs = jax.nn.softmax(scores, axis=-1)
    ctx = jnp.einsum("bchqk,bchkd->bchqd", probs, vh)
    ctx = ctx.transpose(0, 1, 3, 2, 4).reshape(B, C, W, D)
    hidden = ctx @ params["wd"] + params["bd"][0]
    y = hidden + x
    u = jnp.mean(y, axis=-1, keepdims=True)
    s = jnp.mean((y - u) ** 2, axis=-1, keepdims=True)
    y = (y - u) / jnp.sqrt(s + eps)
    return params["gamma"][0] * y + params["beta"][0]


def init_params(key, input_size, hidden_size):
    ks = jax.random.split(key, 8)
    std = 0.02
    return {
        "wq": std * jax.random.normal(ks[0], (input_size, hidden_size), jnp.float32),
        "bq": std * jax.random.normal(ks[1], (1, hidden_size), jnp.float32),
        "wk": std * jax.random.normal(ks[2], (input_size, hidden_size), jnp.float32),
        "bk": std * jax.random.normal(ks[3], (1, hidden_size), jnp.float32),
        "wv": std * jax.random.normal(ks[4], (input_size, hidden_size), jnp.float32),
        "bv": std * jax.random.normal(ks[5], (1, hidden_size), jnp.float32),
        "wd": std * jax.random.normal(ks[6], (hidden_size, hidden_size), jnp.float32),
        "bd": std * jax.random.normal(ks[7], (1, hidden_size), jnp.float32),
        "gamma": jnp.ones((1, hidden_size), jnp.float32),
        "beta": jnp.zeros((1, hidden_size), jnp.float32),
    }


if __name__ == "__main__":
    # Small shapes consistent with the module: input_size == hidden_size
    # (required by the residual add); attention runs over the W axis.
    B, C, W = 2, 4, 8
    num_heads, hidden = 4, 32

    key = jax.random.PRNGKey(0)
    kx, kp = jax.random.split(key)
    x = jax.random.normal(kx, (B, C, W, hidden), jnp.float32)
    params = init_params(kp, hidden, hidden)
    packed = pack_params(params)          # hoisted: packed once, reused per call

    out = cov_self_attention(x, packed, num_heads)
    out = jax.block_until_ready(out)

    ref = ref_forward(x, params, num_heads)
    # bf16 matmul operands (f32 accumulation) => compare with relaxed tolerance.
    np.testing.assert_allclose(np.asarray(out), np.asarray(ref),
                               rtol=2e-2, atol=2e-2)
    print("KERNEL_OK")
</pallas_src>

<mosaic_0001>
module attributes {stable_mosaic.version = 11 : i64} {
  func.func @_attn_kernel(%arg0: i32, %arg1: memref<8x8x32xf32, #tpu.memory_space<vmem>>, %arg2: memref<32x96xbf16, #tpu.memory_space<vmem>>, %arg3: memref<1x96xf32, #tpu.memory_space<vmem>>, %arg4: memref<32x32xbf16, #tpu.memory_space<vmem>>, %arg5: memref<1x32xf32, #tpu.memory_space<vmem>>, %arg6: memref<1x32xf32, #tpu.memory_space<vmem>>, %arg7: memref<1x32xf32, #tpu.memory_space<vmem>>, %arg8: memref<8x256xf32, #tpu.memory_space<vmem>>) attributes {dimension_semantics = [#tpu.dimension_semantics<parallel>], iteration_bounds = array<i64: 1>, scalar_prefetch = 0 : i64, scratch_operands = 0 : i64, tpu.core_type = #tpu.core_type<tc>, window_params = [{transform_indices = @transform_0, window_bounds = array<i64: 8, 8, 32>}, {pipeline_mode = #tpu.pipeline_mode<synchronous>, transform_indices = @transform_1, window_bounds = array<i64: 32, 96>}, {pipeline_mode = #tpu.pipeline_mode<synchronous>, transform_indices = @transform_2, window_bounds = array<i64: 1, 96>}, {pipeline_mode = #tpu.pipeline_mode<synchronous>, transform_indices = @transform_3, window_bounds = array<i64: 32, 32>}, {pipeline_mode = #tpu.pipeline_mode<synchronous>, transform_indices = @transform_4, window_bounds = array<i64: 1, 32>}, {pipeline_mode = #tpu.pipeline_mode<synchronous>, transform_indices = @transform_5, window_bounds = array<i64: 1, 32>}, {pipeline_mode = #tpu.pipeline_mode<synchronous>, transform_indices = @transform_6, window_bounds = array<i64: 1, 32>}, {transform_indices = @transform_7, window_bounds = array<i64: 8, 256>}]} {
    %c0 = arith.constant 0 : index
    %c0_0 = arith.constant 0 : index
    %c0_1 = arith.constant 0 : index
    %0 = vector.load %arg1[%c0, %c0_0, %c0_1] : memref<8x8x32xf32, #tpu.memory_space<vmem>>, vector<8x8x32xf32>
    %1 = vector.shape_cast %0 : vector<8x8x32xf32> to vector<64x32xf32>
    %2 = arith.truncf %1 : vector<64x32xf32> to vector<64x32xbf16>
    %c0_2 = arith.constant 0 : index
    %c0_3 = arith.constant 0 : index
    %3 = vector.load %arg2[%c0_2, %c0_3] : memref<32x96xbf16, #tpu.memory_space<vmem>>, vector<32x96xbf16>
    %cst = arith.constant dense<0.000000e+00> : vector<64x96xf32>
    %4 = tpu.matmul %2, %3, %cst {dimension_numbers = #tpu.dot_dimension_numbers<[1], [0], [0], [1], [0, 0, 1, 1], [], []>} : vector<64x32xbf16>, vector<32x96xbf16>, vector<64x96xf32> -> vector<64x96xf32>
    %c0_4 = arith.constant 0 : index
    %c0_5 = arith.constant 0 : index
    %5 = vector.load %arg3[%c0_4, %c0_5] : memref<1x96xf32, #tpu.memory_space<vmem>>, vector<1x96xf32>
    %6 = vector.broadcast %5 : vector<1x96xf32> to vector<64x96xf32>
    %7 = arith.addf %4, %6 : vector<64x96xf32>
    %8 = arith.truncf %7 : vector<64x96xf32> to vector<64x96xbf16>
    %9 = vector.extract_strided_slice %8 {offsets = [0, 0], sizes = [64, 8], strides = [1, 1]} : vector<64x96xbf16> to vector<64x8xbf16>
    %10 = vector.shape_cast %9 : vector<64x8xbf16> to vector<8x8x8xbf16>
    %11 = vector.extract_strided_slice %8 {offsets = [0, 8], sizes = [64, 8], strides = [1, 1]} : vector<64x96xbf16> to vector<64x8xbf16>
    %12 = vector.shape_cast %11 : vector<64x8xbf16> to vector<8x8x8xbf16>
    %13 = vector.extract_strided_slice %8 {offsets = [0, 16], sizes = [64, 8], strides = [1, 1]} : vector<64x96xbf16> to vector<64x8xbf16>
    %14 = vector.shape_cast %13 : vector<64x8xbf16> to vector<8x8x8xbf16>
    %15 = vector.extract_strided_slice %8 {offsets = [0, 24], sizes = [64, 8], strides = [1, 1]} : vector<64x96xbf16> to vector<64x8xbf16>
    %16 = vector.shape_cast %15 : vector<64x8xbf16> to vector<8x8x8xbf16>
    %17 = tpu.concatenate %10, %12, %14, %16 in 0 : vector<8x8x8xbf16>, vector<8x8x8xbf16>, vector<8x8x8xbf16>, vector<8x8x8xbf16> -> vector<32x8x8xbf16>
    %18 = vector.extract_strided_slice %8 {offsets = [0, 32], sizes = [64, 8], strides = [1, 1]} : vector<64x96xbf16> to vector<64x8xbf16>
    %19 = vector.shape_cast %18 : vector<64x8xbf16> to vector<8x8x8xbf16>
    %20 = vector.extract_strided_slice %8 {offsets = [0, 40], sizes = [64, 8], strides = [1, 1]} : vector<64x96xbf16> to vector<64x8xbf16>
    %21 = vector.shape_cast %20 : vector<64x8xbf16> to vector<8x8x8xbf16>
    %22 = vector.extract_strided_slice %8 {offsets = [0, 48], sizes = [64, 8], strides = [1, 1]} : vector<64x96xbf16> to vector<64x8xbf16>
    %23 = vector.shape_cast %22 : vector<64x8xbf16> to vector<8x8x8xbf16>
    %24 = vector.extract_strided_slice %8 {offsets = [0, 56], sizes = [64, 8], strides = [1, 1]} : vector<64x96xbf16> to vector<64x8xbf16>
    %25 = vector.shape_cast %24 : vector<64x8xbf16> to vector<8x8x8xbf16>
    %26 = tpu.concatenate %19, %21, %23, %25 in 0 : vector<8x8x8xbf16>, vector<8x8x8xbf16>, vector<8x8x8xbf16>, vector<8x8x8xbf16> -> vector<32x8x8xbf16>
    %27 = vector.extract_strided_slice %8 {offsets = [0, 64], sizes = [64, 8], strides = [1, 1]} : vector<64x96xbf16> to vector<64x8xbf16>
    %28 = vector.shape_cast %27 : vector<64x8xbf16> to vector<8x8x8xbf16>
    %29 = vector.extract_strided_slice %8 {offsets = [0, 72], sizes = [64, 8], strides = [1, 1]} : vector<64x96xbf16> to vector<64x8xbf16>
    %30 = vector.shape_cast %29 : vector<64x8xbf16> to vector<8x8x8xbf16>
    %31 = vector.extract_strided_slice %8 {offsets = [0, 80], sizes = [64, 8], strides = [1, 1]} : vector<64x96xbf16> to vector<64x8xbf16>
    %32 = vector.shape_cast %31 : vector<64x8xbf16> to vector<8x8x8xbf16>
    %33 = vector.extract_strided_slice %8 {offsets = [0, 88], sizes = [64, 8], strides = [1, 1]} : vector<64x96xbf16> to vector<64x8xbf16>
    %34 = vector.shape_cast %33 : vector<64x8xbf16> to vector<8x8x8xbf16>
    %35 = tpu.concatenate %28, %30, %32, %34 in 0 : vector<8x8x8xbf16>, vector<8x8x8xbf16>, vector<8x8x8xbf16>, vector<8x8x8xbf16> -> vector<32x8x8xbf16>
    "tpu.trace_start"() <{level = 10 : i32, message = "bqd,bkd->bqk"}> : () -> ()
    %cst_6 = arith.constant dense<0.000000e+00> : vector<32x8x8xf32>
    %36 = tpu.matmul %17, %26, %cst_6 {dimension_numbers = #tpu.dot_dimension_numbers<[2], [2], [1], [1], [0, 0, 0, 1, 1, 1], [0], [0]>} : vector<32x8x8xbf16>, vector<32x8x8xbf16>, vector<32x8x8xf32> -> vector<32x8x8xf32>
    "tpu.trace_stop"() : () -> ()
    %cst_7 = arith.constant 0.353553385 : f32
    %37 = vector.broadcast %cst_7 : f32 to vector<32x8x8xf32>
    %38 = arith.mulf %36, %37 : vector<32x8x8xf32>
    %cst_8 = arith.constant dense<0xFF800000> : vector<32x8xf32>
    %39 = vector.multi_reduction <maximumf>, %38, %cst_8 [2] : vector<32x8x8xf32> to vector<32x8xf32>
    %40 = vector.shape_cast %39 : vector<32x8xf32> to vector<32x8x1xf32>
    %41 = vector.broadcast %40 : vector<32x8x1xf32> to vector<32x8x8xf32>
    %42 = arith.subf %38, %41 : vector<32x8x8xf32>
    %43 = math.exp %42 : vector<32x8x8xf32>
    %cst_9 = arith.constant dense<0.000000e+00> : vector<32x8xf32>
    %44 = vector.multi_reduction <add>, %43, %cst_9 [2] : vector<32x8x8xf32> to vector<32x8xf32>
    %45 = vector.shape_cast %44 : vector<32x8xf32> to vector<32x8x1xf32>
    %46 = tpu.reciprocal %45 {approx = true} : vector<32x8x1xf32> -> vector<32x8x1xf32>
    %47 = vector.broadcast %46 : vector<32x8x1xf32> to vector<32x8x8xf32>
    %48 = arith.mulf %43, %47 : vector<32x8x8xf32>
    %49 = arith.truncf %48 : vector<32x8x8xf32> to vector<32x8x8xbf16>
    "tpu.trace_start"() <{level = 10 : i32, message = "bqk,bkd->bqd"}> : () -> ()
    %cst_10 = arith.constant dense<0.000000e+00> : vector<32x8x8xf32>
    %50 = tpu.matmul %49, %35, %cst_10 {dimension_numbers = #tpu.dot_dimension_numbers<[2], [1], [1], [2], [0, 0, 0, 1, 1, 2], [0], [0]>} : vector<32x8x8xbf16>, vector<32x8x8xbf16>, vector<32x8x8xf32> -> vector<32x8x8xf32>
    "tpu.trace_stop"() : () -> ()
    %51 = vector.extract_strided_slice %50 {offsets = [0, 0, 0], sizes = [8, 8, 8], strides = [1, 1, 1]} : vector<32x8x8xf32> to vector<8x8x8xf32>
    %52 = vector.extract_strided_slice %50 {offsets = [8, 0, 0], sizes = [8, 8, 8], strides = [1, 1, 1]} : vector<32x8x8xf32> to vector<8x8x8xf32>
    %53 = vector.extract_strided_slice %50 {offsets = [16, 0, 0], sizes = [8, 8, 8], strides = [1, 1, 1]} : vector<32x8x8xf32> to vector<8x8x8xf32>
    %54 = vector.extract_strided_slice %50 {offsets = [24, 0, 0], sizes = [8, 8, 8], strides = [1, 1, 1]} : vector<32x8x8xf32> to vector<8x8x8xf32>
    %55 = tpu.concatenate %51, %52, %53, %54 in 2 : vector<8x8x8xf32>, vector<8x8x8xf32>, vector<8x8x8xf32>, vector<8x8x8xf32> -> vector<8x8x32xf32>
    %56 = vector.shape_cast %55 : vector<8x8x32xf32> to vector<64x32xf32>
    %57 = arith.truncf %56 : vector<64x32xf32> to vector<64x32xbf16>
    %c0_11 = arith.constant 0 : index
    %c0_12 = arith.constant 0 : index
    %58 = vector.load %arg4[%c0_11, %c0_12] : memref<32x32xbf16, #tpu.memory_space<vmem>>, vector<32x32xbf16>
    %cst_13 = arith.constant dense<0.000000e+00> : vector<64x32xf32>
    %59 = tpu.matmul %57, %58, %cst_13 {dimension_numbers = #tpu.dot_dimension_numbers<[1], [0], [0], [1], [0, 0, 1, 1], [], []>} : vector<64x32xbf16>, vector<32x32xbf16>, vector<64x32xf32> -> vector<64x32xf32>
    %c0_14 = arith.constant 0 : index
    %c0_15 = arith.constant 0 : index
    %60 = vector.load %arg5[%c0_14, %c0_15] : memref<1x32xf32, #tpu.memory_space<vmem>>, vector<1x32xf32>
    %61 = vector.broadcast %60 : vector<1x32xf32> to vector<64x32xf32>
    %62 = arith.addf %59, %61 : vector<64x32xf32>
    %63 = vector.shape_cast %62 : vector<64x32xf32> to vector<8x8x32xf32>
    %64 = arith.addf %63, %0 : vector<8x8x32xf32>
    %cst_16 = arith.constant dense<0.000000e+00> : vector<8x8xf32>
    %65 = vector.multi_reduction <add>, %64, %cst_16 [2] : vector<8x8x32xf32> to vector<8x8xf32>
    %66 = vector.shape_cast %65 : vector<8x8xf32> to vector<8x8x1xf32>
    %cst_17 = arith.constant 3.200000e+01 : f32
    %67 = vector.broadcast %cst_17 : f32 to vector<8x8x1xf32>
    %68 = arith.divf %66, %67 : vector<8x8x1xf32>
    %69 = vector.broadcast %68 : vector<8x8x1xf32> to vector<8x8x32xf32>
    %70 = arith.subf %64, %69 : vector<8x8x32xf32>
    %71 = arith.mulf %70, %70 : vector<8x8x32xf32>
    %cst_18 = arith.constant dense<0.000000e+00> : vector<8x8xf32>
    %72 = vector.multi_reduction <add>, %71, %cst_18 [2] : vector<8x8x32xf32> to vector<8x8xf32>
    %73 = vector.shape_cast %72 : vector<8x8xf32> to vector<8x8x1xf32>
    %cst_19 = arith.constant 3.200000e+01 : f32
    %74 = vector.broadcast %cst_19 : f32 to vector<8x8x1xf32>
    %75 = arith.divf %73, %74 : vector<8x8x1xf32>
    %cst_20 = arith.constant 9.99999996E-13 : f32
    %76 = vector.broadcast %cst_20 : f32 to vector<8x8x1xf32>
    %77 = arith.addf %75, %76 : vector<8x8x1xf32>
    %78 = math.rsqrt %77 : vector<8x8x1xf32>
    %79 = vector.broadcast %78 : vector<8x8x1xf32> to vector<8x8x32xf32>
    %80 = arith.mulf %70, %79 : vector<8x8x32xf32>
    %c0_21 = arith.constant 0 : index
    %c0_22 = arith.constant 0 : index
    %81 = vector.load %arg6[%c0_21, %c0_22] : memref<1x32xf32, #tpu.memory_space<vmem>>, vector<1x32xf32>
    %82 = vector.shape_cast %81 : vector<1x32xf32> to vector<1x1x32xf32>
    %83 = vector.broadcast %82 : vector<1x1x32xf32> to vector<8x8x32xf32>
    %84 = arith.mulf %83, %80 : vector<8x8x32xf32>
    %c0_23 = arith.constant 0 : index
    %c0_24 = arith.constant 0 : index
    %85 = vector.load %arg7[%c0_23, %c0_24] : memref<1x32xf32, #tpu.memory_space<vmem>>, vector<1x32xf32>
    %86 = vector.shape_cast %85 : vector<1x32xf32> to vector<1x1x32xf32>
    %87 = vector.broadcast %86 : vector<1x1x32xf32> to vector<8x8x32xf32>
    %88 = arith.addf %84, %87 : vector<8x8x32xf32>
    %89 = vector.shape_cast %88 : vector<8x8x32xf32> to vector<8x256xf32>
    %c0_25 = arith.constant 0 : index
    %c0_26 = arith.constant 0 : index
    %90 = vector.load %arg8[%c0_25, %c0_26] : memref<8x256xf32, #tpu.memory_space<vmem>>, vector<8x256xf32>
    tpu.vector_store %arg8[%c0_25, %c0_26], %89 {strides = array<i32>} : memref<8x256xf32, #tpu.memory_space<vmem>>, vector<8x256xf32>,
    return
  }
  func.func @transform_0(%arg0: i32) -> (i32, i32, i32) {
    %c0_i32 = arith.constant 0 : i32
    %c0_i32_0 = arith.constant 0 : i32
    %c0_i32_1 = arith.constant 0 : i32
    return %arg0, %c0_i32, %c0_i32_0 : i32, i32, i32
  }
  func.func @transform_1(%arg0: i32) -> (i32, i32) {
    %c0_i32 = arith.constant 0 : i32
    %c0_i32_0 = arith.constant 0 : i32
    %c0_i32_1 = arith.constant 0 : i32
    return %c0_i32, %c0_i32_0 : i32, i32
  }
  func.func @transform_2(%arg0: i32) -> (i32, i32) {
    %c0_i32 = arith.constant 0 : i32
    %c0_i32_0 = arith.constant 0 : i32
    %c0_i32_1 = arith.constant 0 : i32
    return %c0_i32, %c0_i32_0 : i32, i32
  }
  func.func @transform_3(%arg0: i32) -> (i32, i32) {
    %c0_i32 = arith.constant 0 : i32
    %c0_i32_0 = arith.constant 0 : i32
    %c0_i32_1 = arith.constant 0 : i32
    return %c0_i32, %c0_i32_0 : i32, i32
  }
  func.func @transform_4(%arg0: i32) -> (i32, i32) {
    %c0_i32 = arith.constant 0 : i32
    %c0_i32_0 = arith.constant 0 : i32
    %c0_i32_1 = arith.constant 0 : i32
    return %c0_i32, %c0_i32_0 : i32, i32
  }
  func.func @transform_5(%arg0: i32) -> (i32, i32) {
    %c0_i32 = arith.constant 0 : i32
    %c0_i32_0 = arith.constant 0 : i32
    %c0_i32_1 = arith.constant 0 : i32
    return %c0_i32, %c0_i32_0 : i32, i32
  }
  func.func @transform_6(%arg0: i32) -> (i32, i32) {
    %c0_i32 = arith.constant 0 : i32
    %c0_i32_0 = arith.constant 0 : i32
    %c0_i32_1 = arith.constant 0 : i32
    return %c0_i32, %c0_i32_0 : i32, i32
  }
  func.func @transform_7(%arg0: i32) -> (i32, i32) {
    %c0_i32 = arith.constant 0 : i32
    %c0_i32_0 = arith.constant 0 : i32
    return %arg0, %c0_i32 : i32, i32
  }
}

</mosaic_0001>

<bundles_post_ra>
// kernel: tpu_custom_call.1
= control target key start
LH: loop header
LB: loop body
LE: loop exit
PB: predicated region body
PF: predicated region fallthrough
CT: control target
= control target key end

     0   :  { %12 = vsyncpa [#allocation3], 0  ;;  %s6689_s0 = inlined_call_operand.hbm [shape: f32[8,8,32], index: 0, kind: input, shape index: {}]   ;;  %s6690_s1 = inlined_call_operand.hbm [shape: bf16[32,96], index: 1, kind: input, shape index: {}]   ;;  %s6691_s2 = inlined_call_operand.vmem [shape: f32[1,96], index: 2, kind: input, shape index: {}]   ;;  %s6692_s3 = inlined_call_operand.hbm [shape: bf16[32,32], index: 3, kind: input, shape index: {}]   ;;  %s6693_s4 = inlined_call_operand.vmem [shape: f32[1,32], index: 4, kind: input, shape index: {}]   ;;  %s6694_s5 = inlined_call_operand.vmem [shape: f32[1,32], index: 5, kind: input, shape index: {}]   ;;  %s6695_s6 = inlined_call_operand.vmem [shape: f32[1,32], index: 6, kind: input, shape index: {}]   ;;  %s6696_s7 = inlined_call_operand.hbm [shape: f32[8,256], index: 7, kind: output, shape index: {}]  }
   0x1   :  { %13 = vsyncpa [#allocation6], 0 }
   0x2   :  { %14 = vsyncpa [#allocation4], 0  ;;  %s5348_s24 = smov [#allocation5]   ;;  %s5254_s28 = scalar_lea.hbm %s6690_s1, 256 }
   0x3   :  { %s32_s25 = sshll.u32 %s5348_s24, 4  ;;  %p5255_p0 = scmp.ne.s32.totalorder %s6690_s1, %s5254_s28  ;;  %s33_s25 = int_to_ptr.vmem [resolvable:$true] %s32_s25 }
   0x4   :  { %p5258_p1 = scmp.lt.u32.totalorder %s5254_s28, %s6690_s1 }
   0x6   :  { %p5260_p2 = pnand %p5258_p1, %p5255_p0 }
   0x8   :  { %5263 = shalt.err (!%p5260_p2)
}
   0x9   :  { %s5264_s10 = scalar_lea.vmem %s33_s25, 256  ;;  %p5269_p4 = scmp.lt.s32.totalorder %s33_s25, %s33_s25 }
   0xa   :  { %p5265_p3 = scmp.ne.s32.totalorder %s33_s25, %s5264_s10  ;;  %p5270_p5 = scmp.lt.s32.totalorder %s5264_s10, %s5264_s10 }
   0xc   :  { %p5271_p6 = por %p5270_p5, %p5269_p4 }
   0xe   :  { %p5272_p7 = pnand %p5271_p6, %p5265_p3 }
  0x10   :  { %5275 = shalt.err (!%p5272_p7)
}
  0x11   :  { %s5349_s11 = smov 64   ;;  %s5350_s12 = smov 4  }
  0x12   :  { %38 = dma.hbm_to_vmem [thread:$0]  %s6690_s1, 256, %s33_s25, [#allocation6], %s5349_s11, %s5349_s11, %s5350_s12  }
  0x13   :  { %s5351_s15 = smov [#allocation2]   ;;  %s5276_s19 = scalar_lea.hbm %s6689_s0, 1024 }
  0x14   :  { %s20_s16 = sshll.u32 %s5351_s15, 4  ;;  %p5277_p8 = scmp.ne.s32.totalorder %s6689_s0, %s5276_s19  ;;  %s21_s16 = int_to_ptr.vmem [resolvable:$true] %s20_s16 }
  0x15   :  { %p5280_p9 = scmp.lt.u32.totalorder %s5276_s19, %s6689_s0 }
  0x17   :  { %p5282_p10 = pnand %p5280_p9, %p5277_p8 }
  0x19   :  { %5285 = shalt.err (!%p5282_p10)
}
  0x1a   :  { %s5286_s24 = scalar_lea.vmem %s21_s16, 1024  ;;  %p5291_p12 = scmp.lt.s32.totalorder %s21_s16, %s21_s16 }
  0x1b   :  { %p5287_p11 = scmp.ne.s32.totalorder %s21_s16, %s5286_s24  ;;  %p5292_p13 = scmp.lt.s32.totalorder %s5286_s24, %s5286_s24 }
  0x1d   :  { %p5293_p0 = por %p5292_p13, %p5291_p12 }
  0x1f   :  { %p5294_p1 = pnand %p5293_p0, %p5287_p11 }
  0x21   :  { %5297 = shalt.err (!%p5294_p1)
}
  0x22   :  { %s5352_s1 = smov 128   ;;  %s5353_s25 = smov 8  }
  0x23   :  { %26 = dma.hbm_to_vmem [thread:$0]  %s6689_s0, 1024, %s21_s16, [#allocation3], %s5352_s1, %s5352_s1, %s5353_s25  }
  0x24   :  { %s5354_s28 = smov [#allocation7]   ;;  %s5298_s9 = scalar_lea.hbm %s6692_s3, 256 }
  0x25   :  { %s46_s29 = sshll.u32 %s5354_s28, 4  ;;  %p5299_p2 = scmp.ne.s32.totalorder %s6692_s3, %s5298_s9  ;;  %s47_s29 = int_to_ptr.vmem [resolvable:$true] %s46_s29 }
  0x26   :  { %p5302_p3 = scmp.lt.u32.totalorder %s5298_s9, %s6692_s3 }
  0x28   :  { %p5304_p4 = pnand %p5302_p3, %p5299_p2 }
  0x2a   :  { %5307 = shalt.err (!%p5304_p4)
}
  0x2b   :  { %s5308_s17 = scalar_lea.vmem %s47_s29, 256  ;;  %p5313_p6 = scmp.lt.s32.totalorder %s47_s29, %s47_s29 }
  0x2c   :  { %p5309_p5 = scmp.ne.s32.totalorder %s47_s29, %s5308_s17  ;;  %p5314_p7 = scmp.lt.s32.totalorder %s5308_s17, %s5308_s17 }
  0x2e   :  { %p5315_p8 = por %p5314_p7, %p5313_p6 }
  0x30   :  { %p5316_p9 = pnand %p5315_p8, %p5309_p5 }
  0x32   :  { %5319 = shalt.err (!%p5316_p9)
}
  0x33   :  { %52 = dma.hbm_to_vmem [thread:$0]  %s6692_s3, 256, %s47_s29, [#allocation6], %s5349_s11, %s5349_s11, %s5350_s12  }
  0x34   :  { %5342 = dma.done.wait [#allocation3], 1024  }
  0x35   :  { %5343 = vsyncadd [#allocation3], 4294966272 }
  0x36   :  { %5344 = dma.done.wait [#allocation6], 512  }
  0x37   :  { %5345 = vsyncadd [#allocation6], 4294966784  ;;  %v5098_v0 = vld [vmem:[#allocation5] sm:$0xff]   ;;  %v5099_v1 = vld [vmem:[#allocation5 + $0x8] sm:$0xff]   ;;  %vm104_vm0 = vcmask 261120   ;;  %s5355_s18 = smov 120  }
  0x38   :  { %4607 = vmatprep.subr.bf16.mxu0 %v5098_v0  ;;  %5015 = vmatprep.subr.bf16.mxu1 %v5098_v0  ;;  %v69_v2 = vld [vmem:[#allocation2] sm:$0xff]  ;;  %v70_v3 = vld [vmem:[#allocation2 + $0x8] sm:$0xff]  ;;  %v71_v4 = vld [vmem:[#allocation2 + $0x10] sm:$0xff]  ;;  %v6697_v31 = vmov 0.0   ;;  %vm5357_vm1 = vmmov 0   ;;  %s5359_s19 = smov 112  }
  0x39   :  { %4608 = vmatpush3.bf16.msra.mxu0 %v5098_v0  ;;  %5017 = vmatpush3.bf16.msra.mxu1 %v5098_v0  ;;  %v77_v5 = vpack.c.bf16 %v70_v3, %v69_v2  ;;  %v72_v6 = vld [vmem:[#allocation2 + $0x18] sm:$0xff]  ;;  %v73_v7 = vld [vmem:[#allocation2 + $0x20] sm:$0xff]  ;;  %v74_v8 = vld [vmem:[#allocation2 + $0x28] sm:$0xff]  ;;  %s5360_s20 = smov 104   ;;  %vm256_vm2 = vcmask 64512   ;;  %vm2260_vm3 = vcmask 1043456  }
  0x3a   :  { %4609 = vmatprep.subr.bf16.mxu0 %v5099_v1  ;;  %5016 = vmatprep.subr.bf16.mxu1 %v5099_v1  ;;  %v79_v9 = vpack.c.bf16 %v74_v8, %v73_v7  ;;  %v75_v10 = vld [vmem:[#allocation2 + $0x30] sm:$0xff]  ;;  %v76_v11 = vld [vmem:[#allocation2 + $0x38] sm:$0xff]  ;;  %v78_v12 = vpack.c.bf16 %v72_v6, %v71_v4  ;;  %v4347_v14 = vld [vmem:[%s6691_s2] ss:$0 sm:$0xff]  ;;  %s5358_s2 = smov 96   ;;  %s5361_s21 = smov 16  }
  0x3b   :  { %4611 = vmatprep.mubr.msk.bf16.mxu0 %vm104_vm0, %v77_v5  ;;  %v80_v13 = vpack.c.bf16 %v76_v11, %v75_v10  ;;  %s5362_s22 = smov 24   ;;  %vm3896_vm4 = vcmask 130048   ;;  %vm3905_vm5 = vcmask 195584   ;;  %vm4322_vm6 = vcmask 523264  }
  0x3c   :  { %4615 = vmatprep.mubr.msk.bf16.mxu1 %vm104_vm0, %v79_v9  ;;  %vm4324_vm7 = vcmask 785408  }
  0x3d   :  { %4610 = vmatpush3.bf16.msra.mxu0 %v5099_v1  ;;  %5018 = vmatpush3.bf16.msra.mxu1 %v5099_v1 }
  0x3e   :  { %4619 = vmatprep.subr.bf16.mxu1 %v6697_v31  ;;  %4631 = vmatprep.subr.bf16.mxu0 %v6697_v31 }
  0x40   :  { %4612 = vmatmul.mubr.msk.bf16.vlgmr.msra.gmra.mrb[0].mxu0 %vm104_vm0, %v78_v12  ;;  %4616 = vmatmul.mubr.msk.bf16.vlgmr.msra.gmra.mrb[0].mxu1 %vm104_vm0, %v80_v13 }
  0x41   :  { %4621 = vmatprep.mubr.msk.bf16.mxu1 %vm5357_vm1, %v6697_v31  ;;  %4633 = vmatprep.mubr.msk.bf16.mxu0 %vm5357_vm1, %v6697_v31 }
 0x113   :  { %v4613_v15 = vpop.f32.mrb[0].mxu0  ;;  %v4617_v16 = vpop.f32.mrb[0].mxu1 }
 0x114   :  { %v160_v17 = vadd.f32 %v4613_v15, %v4347_v14  ;;  %v151_v18 = vpop.f32.mrb[1].mxu0  ;;  %v167_v19 = vpop.f32.mrb[1].mxu1  ;;  %v176_v34 = vadd.f32 %v4617_v16, %v4347_v14 }
 0x115   :  { %v152_v20 = vadd.f32 %v4347_v14, %v151_v18  ;;  %v4614_v21 = vpop.f32.mrb[2].mxu0  ;;  %v4618_v22 = vpop.f32.mrb[2].mxu1  ;;  %v168_v30 = vadd.f32 %v4347_v14, %v167_v19 }
 0x116   :  { %v5457_v23 = vpack.c.bf16 %v160_v17, %v160_v17  ;;  %v163_v24 = vadd.f32 %v4614_v21, %v4347_v14  ;;  %v154_v25 = vpop.f32.mrb[3].mxu0  ;;  %v170_v26 = vpop.f32.mrb[3].mxu1  ;;  %v5479_v37 = vpack.c.bf16 %v176_v34, %v176_v34  ;;  %v179_v38 = vadd.f32 %v4618_v22, %v4347_v14 }
 0x117   :  { %v5459_v27 = vpack.c.bf16 %v152_v20, %v152_v20  ;;  %v155_v28 = vadd.f32 %v4347_v14, %v154_v25  ;;  %v171_v29 = vadd.f32 %v4347_v14, %v170_v26  ;;  %v5472_v36 = vpack.c.bf16 %v168_v30, %v168_v30 }
 0x118   :  { %210 = vrot.lane.b32.xlu1 %v5457_v23, %s5355_s18  ;;  %v5464_v32 = vpack.c.bf16 %v163_v24, %v163_v24  ;;  %v5484_v39 = vpack.c.bf16 %v179_v38, %v179_v38 }
 0x119   :  { %206 = vrot.lane.b32.xlu0 %v5459_v27, %s5355_s18  ;;  %v5467_v33 = vpack.c.bf16 %v155_v28, %v155_v28  ;;  %v5469_v35 = vpack.c.bf16 %v171_v29, %v171_v29 }
 0x11c   :  { %212 = vrot.lane.b32.xlu1 %v5464_v32, %s5355_s18 }
 0x11d   :  { %208 = vrot.lane.b32.xlu0 %v5467_v33, %s5355_s18 }
 0x120   :  { %216 = vrot.lane.b32.xlu1 %v5469_v35, %s5355_s18 }
 0x121   :  { %214 = vrot.lane.b32.xlu0 %v5472_v36, %s5355_s18 }
 0x124   :  { %218 = vrot.lane.b32.xlu1 %v5479_v37, %s5355_s18 }
 0x125   :  { %254 = vrot.lane.b32.xlu0 %v5459_v27, %s5358_s2 }
 0x128   :  { %303 = vrot.lane.b32.xlu1 %v5467_v33, %s5358_s2 }
 0x129   :  { %220 = vrot.lane.b32.xlu0 %v5484_v39, %s5355_s18 }
 0x12c   :  { %224 = vrot.lane.b32.xlu1 %v5467_v33, %s5359_s19 }
 0x12d   :  { %222 = vrot.lane.b32.xlu0 %v5459_v27, %s5359_s19 }
 0x130   :  { %399 = vrot.lane.b32.xlu1 %v5464_v32, %s5358_s2 }
 0x131   :  { %351 = vrot.lane.b32.xlu0 %v5457_v23, %s5358_s2 }
 0x134   :  { %228 = vrot.lane.b32.xlu1 %v5464_v32, %s5359_s19 }
 0x135   :  { %226 = vrot.lane.b32.xlu0 %v5457_v23, %s5359_s19 }
 0x138   :  { %495 = vrot.lane.b32.xlu1 %v5469_v35, %s5358_s2 }
 0x139   :  { %447 = vrot.lane.b32.xlu0 %v5472_v36, %s5358_s2 }
 0x13c   :  { %232 = vrot.lane.b32.xlu1 %v5469_v35, %s5359_s19 }
 0x13d   :  { %230 = vrot.lane.b32.xlu0 %v5472_v36, %s5359_s19 }
 0x140   :  { %591 = vrot.lane.b32.xlu1 %v5484_v39, %s5358_s2 }
 0x141   :  { %543 = vrot.lane.b32.xlu0 %v5479_v37, %s5358_s2 }
 0x144   :  { %236 = vrot.lane.b32.xlu1 %v5484_v39, %s5359_s19 }
 0x145   :  { %234 = vrot.lane.b32.xlu0 %v5479_v37, %s5359_s19 }
 0x18a   :  { %v5511_v40 = vpop.permute.xlu1 %210 }
 0x18b   :  { %v5513_v41 = vpop.permute.xlu0 %206  ;;  %v5539_v48 = vcombine.low %v5511_v40, %v5511_v40 }
 0x18c   :  { %v5517_v42 = vcombine.low %v5513_v41, %v5513_v41 }
 0x18e   :  { %v5519_v43 = vpop.permute.xlu1 %212  ;;  %641 = vrot.lane.b32.xlu0 %v5517_v42, %s5358_s2 }
 0x18f   :  { %v5523_v44 = vpop.permute.xlu0 %208  ;;  %v5549_v51 = vcombine.low %v5519_v43, %v5519_v43 }
 0x190   :  { %v5527_v45 = vcombine.low %v5523_v44, %v5523_v44 }
 0x192   :  { %v5529_v46 = vpop.permute.xlu1 %216  ;;  %238 = vrot.lane.b32.xlu0 %v5459_v27, %s5360_s20  ;;  %691 = vrot.lane.b32.xlu1 %v5527_v45, %s5358_s2 }
 0x193   :  { %v5535_v47 = vpop.permute.xlu0 %214  ;;  %v5565_v56 = vcombine.low %v5529_v46, %v5529_v46 }
 0x194   :  { %v5554_v53 = vcombine.low %v5535_v47, %v5535_v47 }
 0x196   :  { %v5541_v49 = vpop.permute.xlu1 %218  ;;  %741 = vrot.lane.b32.xlu0 %v5539_v48, %s5358_s2  ;;  %240 = vrot.lane.b32.xlu1 %v5467_v33, %s5360_s20 }
 0x197   :  { %v255_v50 = vpop.permute.xlu0 %254  ;;  %v5582_v60 = vcombine.low %v5541_v49, %v5541_v49 }
 0x198   :  { %v261_v52 = vsel %vm256_vm2, %v255_v50, 0 }
 0x199   :  { %4620 = vmatpush3.bf16.xpose.msra.mxu1 %v261_v52 }
 0x19a   :  { %v304_v54 = vpop.permute.xlu1 %303  ;;  %242 = vrot.lane.b32.xlu0 %v5457_v23, %s5360_s20  ;;  %791 = vrot.lane.b32.xlu1 %v5549_v51, %s5358_s2 }
 0x19b   :  { %v5560_v55 = vpop.permute.xlu0 %220  ;;  %4625 = vmatprep.subr.bf16.mxu1 %v6697_v31  ;;  %v309_v59 = vsel %vm256_vm2, %v304_v54, 0 }
 0x19c   :  { %v5592_v0 = vcombine.low %v5560_v55, %v5560_v55 }
 0x19e   :  { %v5567_v57 = vpop.permute.xlu1 %224  ;;  %244 = vrot.lane.b32.xlu1 %v5464_v32, %s5360_s20  ;;  %841 = vrot.lane.b32.xlu0 %v5554_v53, %s5358_s2 }
 0x19f   :  { %v5573_v58 = vpop.permute.xlu0 %222  ;;  %v5633_v10 = vcombine.low %v5567_v57, %v5567_v57 }
 0x1a0   :  { %4622 = vmatmul.mubr.msk.bf16.vlgmr.msra.gmra.mrb[4].mxu1 %vm256_vm2, %v5459_v27  ;;  %v5615_v6 = vcombine.low %v5573_v58, %v5573_v58 }
 0x1a1   :  { %4626 = vmatpush3.bf16.xpose.msra.mxu1 %v309_v59  ;;  %4627 = vmatprep.mubr.msk.bf16.mxu1 %vm5357_vm1, %v6697_v31 }
 0x1a2   :  { %v400_v61 = vpop.permute.xlu1 %399  ;;  %891 = vrot.lane.b32.xlu1 %v5565_v56, %s5358_s2  ;;  %246 = vrot.lane.b32.xlu0 %v5472_v36, %s5360_s20 }
 0x1a3   :  { %v352_v62 = vpop.permute.xlu0 %351  ;;  %4637 = vmatprep.subr.bf16.mxu1 %v6697_v31  ;;  %v405_v3 = vsel %vm256_vm2, %v400_v61, 0 }
 0x1a4   :  { %v357_v63 = vsel %vm256_vm2, %v352_v62, 0 }
 0x1a5   :  { %4632 = vmatpush3.bf16.xpose.msra.mxu0 %v357_v63 }
 0x1a6   :  { %v5594_v1 = vpop.permute.xlu1 %228  ;;  %248 = vrot.lane.b32.xlu1 %v5469_v35, %s5360_s20  ;;  %941 = vrot.lane.b32.xlu0 %v5582_v60, %s5358_s2 }
 0x1a7   :  { %v5600_v2 = vpop.permute.xlu0 %226  ;;  %4643 = vmatprep.subr.bf16.mxu0 %v6697_v31  ;;  %v5651_v15 = vcombine.low %v5594_v1, %v5594_v1 }
 0x1a8   :  { %4628 = vmatmul.mubr.msk.bf16.vlgmr.msra.gmra.mrb[8].mxu1 %vm256_vm2, %v5467_v33  ;;  %v5637_v11 = vcombine.low %v5600_v2, %v5600_v2 }
 0x1a9   :  { %4638 = vmatpush3.bf16.xpose.msra.mxu1 %v405_v3  ;;  %4639 = vmatprep.mubr.msk.bf16.mxu1 %vm5357_vm1, %v6697_v31 }
 0x1aa   :  { %v496_v4 = vpop.permute.xlu1 %495  ;;  %250 = vrot.lane.b32.xlu0 %v5479_v37, %s5360_s20  ;;  %991 = vrot.lane.b32.xlu1 %v5592_v0, %s5358_s2 }
 0x1ab   :  { %v448_v5 = vpop.permute.xlu0 %447  ;;  %4649 = vmatprep.subr.bf16.mxu1 %v6697_v31  ;;  %v501_v12 = vsel %vm256_vm2, %v496_v4, 0 }
 0x1ac   :  { %v453_v7 = vsel %vm256_vm2, %v448_v5, 0  ;;  %4634 = vmatmul.mubr.msk.bf16.vlgmr.msra.gmra.mrb[4].mxu0 %vm256_vm2, %v5457_v23 }
 0x1ad   :  { %4644 = vmatpush3.bf16.xpose.msra.mxu0 %v453_v7  ;;  %4645 = vmatprep.mubr.msk.bf16.mxu0 %vm5357_vm1, %v6697_v31 }
 0x1ae   :  { %v5622_v8 = vpop.permute.xlu1 %232  ;;  %252 = vrot.lane.b32.xlu1 %v5484_v39, %s5360_s20  ;;  %1041 = vrot.lane.b32.xlu0 %v5615_v6, %s5358_s2 }
 0x1af   :  { %v5628_v9 = vpop.permute.xlu0 %230  ;;  %4655 = vmatprep.subr.bf16.mxu0 %v6697_v31  ;;  %v5671_v19 = vcombine.low %v5622_v8, %v5622_v8 }
 0x1b0   :  { %4640 = vmatmul.mubr.msk.bf16.vlgmr.msra.gmra.mrb[12].mxu1 %vm256_vm2, %v5464_v32  ;;  %v5655_v16 = vcombine.low %v5628_v9, %v5628_v9 }
 0x1b1   :  { %4650 = vmatpush3.bf16.xpose.msra.mxu1 %v501_v12  ;;  %4651 = vmatprep.mubr.msk.bf16.mxu1 %vm5357_vm1, %v6697_v31 }
 0x1b2   :  { %1091 = vrot.lane.b32.xlu1 %v5633_v10, %s5358_s2  ;;  %1141 = vrot.lane.b32.xlu0 %v5637_v11, %s5358_s2  ;;  %v592_v13 = vpop.permute.xlu1 %591 }
 0x1b3   :  { %v544_v14 = vpop.permute.xlu0 %543  ;;  %4661 = vmatprep.subr.bf16.mxu1 %v6697_v31  ;;  %v597_v20 = vsel %vm256_vm2, %v592_v13, 0 }
 0x1b4   :  { %v549_v17 = vsel %vm256_vm2, %v544_v14, 0  ;;  %4646 = vmatmul.mubr.msk.bf16.vlgmr.msra.gmra.mrb[8].mxu0 %vm256_vm2, %v5472_v36 }
 0x1b5   :  { %4656 = vmatpush3.bf16.xpose.msra.mxu0 %v549_v17  ;;  %4657 = vmatprep.mubr.msk.bf16.mxu0 %vm5357_vm1, %v6697_v31 }
 0x1b6   :  { %1191 = vrot.lane.b32.xlu1 %v5651_v15, %s5358_s2  ;;  %1241 = vrot.lane.b32.xlu0 %v5655_v16, %s5358_s2  ;;  %v5680_v22 = vpop.permute.xlu1 %236 }
 0x1b7   :  { %v5666_v18 = vpop.permute.xlu0 %234  ;;  %4667 = vmatprep.subr.bf16.mxu0 %v6697_v31  ;;  %v5691_v24 = vcombine.low %v5680_v22, %v5680_v22 }
 0x1b8   :  { %v5676_v21 = vcombine.low %v5666_v18, %v5666_v18  ;;  %4652 = vmatmul.mubr.msk.bf16.vlgmr.msra.gmra.mrb[16].mxu1 %vm256_vm2, %v5469_v35 }
 0x1b9   :  { %4662 = vmatpush3.bf16.xpose.msra.mxu1 %v597_v20  ;;  %4663 = vmatprep.mubr.msk.bf16.mxu1 %vm5357_vm1, %v6697_v31 }
 0x1ba   :  { %1291 = vrot.lane.b32.xlu1 %v5671_v19, %s5358_s2  ;;  %1341 = vrot.lane.b32.xlu0 %v5676_v21, %s5358_s2 }
 0x1bb   :  { %4673 = vmatprep.subr.bf16.mxu1 %v6697_v31 }
 0x1bc   :  { %4658 = vmatmul.mubr.msk.bf16.vlgmr.msra.gmra.mrb[12].mxu0 %vm256_vm2, %v5479_v37 }
 0x1bd   :  { %4669 = vmatprep.mubr.msk.bf16.mxu0 %vm5357_vm1, %v6697_v31 }
 0x1be   :  { %1391 = vrot.lane.b32.xlu1 %v5691_v24, %s5358_s2 }
 0x1c0   :  { %4664 = vmatmul.mubr.msk.bf16.vlgmr.msra.gmra.mrb[20].mxu1 %vm256_vm2, %v5484_v39 }
 0x1c1   :  { %4675 = vmatprep.mubr.msk.bf16.mxu1 %vm5357_vm1, %v6697_v31 }
 0x200   :  { %v642_v25 = vpop.permute.xlu0 %641 }
 0x201   :  { %v647_v26 = vsel %vm256_vm2, %v642_v25, 0 }
 0x202   :  { %4668 = vmatpush3.bf16.xpose.msra.mxu0 %v647_v26 }
 0x203   :  { %4679 = vmatprep.subr.bf16.mxu0 %v6697_v31 }
 0x204   :  { %v692_v28 = vpop.permute.xlu1 %691  ;;  %v5705_v29 = vpop.permute.xlu0 %238 }
 0x205   :  { %v697_v30 = vsel %vm256_vm2, %v692_v28, 0  ;;  %v5710_v34 = vcombine.low %v5705_v29, %v5705_v29 }
 0x206   :  { %4674 = vmatpush3.bf16.xpose.msra.mxu1 %v697_v30 }
 0x207   :  { %1441 = vrot.lane.b32.xlu0 %v5710_v34, %s5358_s2  ;;  %4685 = vmatprep.subr.bf16.mxu1 %v6697_v31 }
 0x208   :  { %v5715_v38 = vpop.permute.xlu1 %240  ;;  %v742_v50 = vpop.permute.xlu0 %741 }
 0x209   :  { %v5719_v52 = vcombine.low %v5715_v38, %v5715_v38  ;;  %v747_v54 = vsel %vm256_vm2, %v742_v50, 0  ;;  %4670 = vmatmul.mubr.msk.bf16.vlgmr.msra.gmra.mrb[16].mxu0 %vm256_vm2, %v5513_v41 }
 0x20a   :  { %4680 = vmatpush3.bf16.xpose.msra.mxu0 %v747_v54  ;;  %4681 = vmatprep.mubr.msk.bf16.mxu0 %vm5357_vm1, %v6697_v31 }
 0x20b   :  { %1491 = vrot.lane.b32.xlu1 %v5719_v52, %s5358_s2  ;;  %4691 = vmatprep.subr.bf16.mxu0 %v6697_v31 }
 0x20c   :  { %v792_v59 = vpop.permute.xlu1 %791  ;;  %v5729_v61 = vpop.permute.xlu0 %242 }
 0x20d   :  { %v797_v62 = vsel %vm256_vm2, %v792_v59, 0  ;;  %v5734_v63 = vcombine.low %v5729_v61, %v5729_v61  ;;  %4676 = vmatmul.mubr.msk.bf16.vlgmr.msra.gmra.mrb[24].mxu1 %vm256_vm2, %v5523_v44 }
 0x20e   :  { %4686 = vmatpush3.bf16.xpose.msra.mxu1 %v797_v62  ;;  %4687 = vmatprep.mubr.msk.bf16.mxu1 %vm5357_vm1, %v6697_v31 }
 0x20f   :  { %1541 = vrot.lane.b32.xlu0 %v5734_v63, %s5358_s2  ;;  %4697 = vmatprep.subr.bf16.mxu1 %v6697_v31 }
 0x210   :  { %v5743_v41 = vpop.permute.xlu1 %244  ;;  %v842_v3 = vpop.permute.xlu0 %841 }
 0x211   :  { %v5747_v4 = vcombine.low %v5743_v41, %v5743_v41  ;;  %v847_v5 = vsel %vm256_vm2, %v842_v3, 0  ;;  %4682 = vmatmul.mubr.msk.bf16.vlgmr.msra.gmra.mrb[20].mxu0 %vm256_vm2, %v5511_v40 }
 0x212   :  { %4692 = vmatpush3.bf16.xpose.msra.mxu0 %v847_v5  ;;  %4693 = vmatprep.mubr.msk.bf16.mxu0 %vm5357_vm1, %v6697_v31 }
 0x213   :  { %1591 = vrot.lane.b32.xlu1 %v5747_v4, %s5358_s2  ;;  %4703 = vmatprep.subr.bf16.mxu0 %v6697_v31 }
 0x214   :  { %v892_v44 = vpop.permute.xlu1 %891  ;;  %v5757_v7 = vpop.permute.xlu0 %246 }
 0x215   :  { %v897_v12 = vsel %vm256_vm2, %v892_v44, 0  ;;  %v5762_v13 = vcombine.low %v5757_v7, %v5757_v7  ;;  %4688 = vmatmul.mubr.msk.bf16.vlgmr.msra.gmra.mrb[28].mxu1 %vm256_vm2, %v5519_v43 }
 0x216   :  { %4698 = vmatpush3.bf16.xpose.msra.mxu1 %v897_v12  ;;  %4699 = vmatprep.mubr.msk.bf16.mxu1 %vm5357_vm1, %v6697_v31 }
 0x217   :  { %1641 = vrot.lane.b32.xlu0 %v5762_v13, %s5358_s2  ;;  %4709 = vmatprep.subr.bf16.mxu1 %v6697_v31 }
 0x218   :  { %v5771_v40 = vpop.permute.xlu1 %248  ;;  %v942_v14 = vpop.permute.xlu0 %941 }
 0x219   :  { %v5775_v17 = vcombine.low %v5771_v40, %v5771_v40  ;;  %v947_v20 = vsel %vm256_vm2, %v942_v14, 0  ;;  %4694 = vmatmul.mubr.msk.bf16.vlgmr.msra.gmra.mrb[24].mxu0 %vm256_vm2, %v5535_v47 }
 0x21a   :  { %4704 = vmatpush3.bf16.xpose.msra.mxu0 %v947_v20  ;;  %4705 = vmatprep.mubr.msk.bf16.mxu0 %vm5357_vm1, %v6697_v31 }
 0x21b   :  { %1691 = vrot.lane.b32.xlu1 %v5775_v17, %s5358_s2  ;;  %4715 = vmatprep.subr.bf16.mxu0 %v6697_v31 }
 0x21c   :  { %v992_v43 = vpop.permute.xlu1 %991  ;;  %v5785_v25 = vpop.permute.xlu0 %250 }
 0x21d   :  { %v997_v26 = vsel %vm256_vm2, %v992_v43, 0  ;;  %v5790_v28 = vcombine.low %v5785_v25, %v5785_v25  ;;  %4700 = vmatmul.mubr.msk.bf16.vlgmr.msra.gmra.mrb[32].mxu1 %vm256_vm2, %v5529_v46 }
 0x21e   :  { %4710 = vmatpush3.bf16.xpose.msra.mxu1 %v997_v26  ;;  %4711 = vmatprep.mubr.msk.bf16.mxu1 %vm5357_vm1, %v6697_v31 }
 0x21f   :  { %6701 = vst [vmem:[#allocation12_spill] sm:$0xff] %v5790_v28  ;;  %1741 = vrot.lane.b32.xlu0 %v5790_v28, %s5358_s2  ;;  %4721 = vmatprep.subr.bf16.mxu1 %v6697_v31 }
 0x220   :  { %v5799_v47 = vpop.permute.xlu1 %252  ;;  %v1042_v30 = vpop.permute.xlu0 %1041 }
 0x221   :  { %v5803_v50 = vcombine.low %v5799_v47, %v5799_v47  ;;  %v1047_v54 = vsel %vm256_vm2, %v1042_v30, 0  ;;  %4706 = vmatmul.mubr.msk.bf16.vlgmr.msra.gmra.mrb[28].mxu0 %vm256_vm2, %v5541_v49 }
 0x222   :  { %4716 = vmatpush3.bf16.xpose.msra.mxu0 %v1047_v54  ;;  %4717 = vmatprep.mubr.msk.bf16.mxu0 %vm5357_vm1, %v6697_v31 }
 0x223   :  { %6702 = vst [vmem:[#allocation13_spill] sm:$0xff] %v5803_v50  ;;  %1791 = vrot.lane.b32.xlu1 %v5803_v50, %s5358_s2  ;;  %2304 = vrot.lane.b32.xlu0 %v5467_v33, %s5349_s11 }
 0x224   :  { %v1092_v46 = vpop.permute.xlu1 %1091  ;;  %4727 = vmatprep.subr.bf16.mxu0 %v6697_v31  ;;  %v1142_v62 = vpop.permute.xlu0 %1141 }
 0x225   :  { %v1097_v59 = vsel %vm256_vm2, %v1092_v46, 0  ;;  %4712 = vmatmul.mubr.msk.bf16.vlgmr.msra.gmra.mrb[36].mxu1 %vm256_vm2, %v5560_v55  ;;  %v1147_v33 = vsel %vm256_vm2, %v1142_v62, 0 }
 0x226   :  { %4722 = vmatpush3.bf16.xpose.msra.mxu1 %v1097_v59  ;;  %4723 = vmatprep.mubr.msk.bf16.mxu1 %vm5357_vm1, %v6697_v31 }
 0x227   :  { %2255 = vrot.lane.b32.xlu1 %v5459_v27, %s5349_s11  ;;  %2400 = vrot.lane.b32.xlu0 %v5464_v32, %s5349_s11 }
 0x228   :  { %4733 = vmatprep.subr.bf16.mxu1 %v6697_v31  ;;  %v1192_v49 = vpop.permute.xlu1 %1191  ;;  %v1242_v32 = vpop.permute.xlu0 %1241 }
 0x229   :  { %4718 = vmatmul.mubr.msk.bf16.vlgmr.msra.gmra.mrb[32].mxu0 %vm256_vm2, %v5573_v58  ;;  %v1197_v27 = vsel %vm256_vm2, %v1192_v49, 0 }
 0x22a   :  { %4728 = vmatpush3.bf16.xpose.msra.mxu0 %v1147_v33  ;;  %4729 = vmatprep.mubr.msk.bf16.mxu0 %vm5357_vm1, %v6697_v31 }
 0x22b   :  { %2352 = vrot.lane.b32.xlu1 %v5457_v23, %s5349_s11  ;;  %2496 = vrot.lane.b32.xlu0 %v5469_v35, %s5349_s11  ;;  %v1247_v23 = vsel %vm256_vm2, %v1242_v32, 0 }
 0x22c   :  { %4739 = vmatprep.subr.bf16.mxu0 %v6697_v31  ;;  %v1292_v35 = vpop.permute.xlu1 %1291 }
 0x22d   :  { %4724 = vmatmul.mubr.msk.bf16.vlgmr.msra.gmra.mrb[40].mxu1 %vm256_vm2, %v5567_v57 }
 0x22e   :  { %4734 = vmatpush3.bf16.xpose.msra.mxu1 %v1197_v27  ;;  %4735 = vmatprep.mubr.msk.bf16.mxu1 %vm5357_vm1, %v6697_v31 }
 0x22f   :  { %2448 = vrot.lane.b32.xlu1 %v5472_v36, %s5349_s11  ;;  %2592 = vrot.lane.b32.xlu0 %v5484_v39, %s5349_s11  ;;  %v1297_v36 = vsel %vm256_vm2, %v1292_v35, 0  ;;  %v1342_v39 = vpop.permute.xlu0 %1341 }
 0x230   :  { %4745 = vmatprep.subr.bf16.mxu1 %v6697_v31 }
 0x231   :  { %4730 = vmatmul.mubr.msk.bf16.vlgmr.msra.gmra.mrb[36].mxu0 %vm256_vm2, %v5600_v2 }
 0x232   :  { %4740 = vmatpush3.bf16.xpose.msra.mxu0 %v1247_v23  ;;  %4741 = vmatprep.mubr.msk.bf16.mxu0 %vm5357_vm1, %v6697_v31 }
 0x233   :  { %2544 = vrot.lane.b32.xlu1 %v5479_v37, %s5349_s11  ;;  %2784 = vrot.lane.b32.xlu0 %v5549_v51, %s5349_s11  ;;  %v1347_v37 = vsel %vm256_vm2, %v1342_v39, 0  ;;  %v1392_v51 = vpop.permute.xlu1 %1391 }
 0x234   :  { %4751 = vmatprep.subr.bf16.mxu0 %v6697_v31 }
 0x235   :  { %4736 = vmatmul.mubr.msk.bf16.vlgmr.msra.gmra.mrb[44].mxu1 %vm256_vm2, %v5594_v1 }
 0x236   :  { %4746 = vmatpush3.bf16.xpose.msra.mxu1 %v1297_v36  ;;  %4747 = vmatprep.mubr.msk.bf16.mxu1 %vm5357_vm1, %v6697_v31 }
 0x237   :  { %2640 = vrot.lane.b32.xlu1 %v5517_v42, %s5349_s11  ;;  %2976 = vrot.lane.b32.xlu0 %v5592_v0, %s5349_s11  ;;  %v1397_v42 = vsel %vm256_vm2, %v1392_v51, 0 }
 0x238   :  { %4757 = vmatprep.subr.bf16.mxu1 %v6697_v31 }
 0x239   :  { %4742 = vmatmul.mubr.msk.bf16.vlgmr.msra.gmra.mrb[40].mxu0 %vm256_vm2, %v5628_v9 }
 0x23a   :  { %4752 = vmatpush3.bf16.xpose.msra.mxu0 %v1347_v37  ;;  %4753 = vmatprep.mubr.msk.bf16.mxu0 %vm5357_vm1, %v6697_v31 }
 0x23b   :  { %2736 = vrot.lane.b32.xlu1 %v5539_v48, %s5349_s11  ;;  %3168 = vrot.lane.b32.xlu0 %v5651_v15, %s5349_s11 }
 0x23c   :  { %4763 = vmatprep.subr.bf16.mxu0 %v6697_v31 }
 0x23d   :  { %4748 = vmatmul.mubr.msk.bf16.vlgmr.msra.gmra.mrb[48].mxu1 %vm256_vm2, %v5622_v8 }
 0x23e   :  { %4758 = vmatpush3.bf16.xpose.msra.mxu1 %v1397_v42  ;;  %4759 = vmatprep.mubr.msk.bf16.mxu1 %vm5357_vm1, %v6697_v31 }
 0x23f   :  { %2832 = vrot.lane.b32.xlu1 %v5554_v53, %s5349_s11  ;;  %2688 = vrot.lane.b32.xlu0 %v5527_v45, %s5349_s11 }
 0x240   :  { %4769 = vmatprep.subr.bf16.mxu1 %v6697_v31 }
 0x241   :  { %4754 = vmatmul.mubr.msk.bf16.vlgmr.msra.gmra.mrb[44].mxu0 %vm256_vm2, %v5666_v18 }
 0x242   :  { %4765 = vmatprep.mubr.msk.bf16.mxu0 %vm5357_vm1, %v6697_v31 }
 0x243   :  { %2928 = vrot.lane.b32.xlu1 %v5582_v60, %s5349_s11  ;;  %2880 = vrot.lane.b32.xlu0 %v5565_v56, %s5349_s11 }
 0x245   :  { %4760 = vmatmul.mubr.msk.bf16.vlgmr.msra.gmra.mrb[52].mxu1 %vm256_vm2, %v5680_v22 }
 0x246   :  { %4771 = vmatprep.mubr.msk.bf16.mxu1 %vm5357_vm1, %v6697_v31 }
 0x247   :  { %3024 = vrot.lane.b32.xlu1 %v5615_v6, %s5349_s11  ;;  %3072 = vrot.lane.b32.xlu0 %v5633_v10, %s5349_s11 }
 0x24b   :  { %3120 = vrot.lane.b32.xlu1 %v5637_v11, %s5349_s11  ;;  %3264 = vrot.lane.b32.xlu0 %v5671_v19, %s5349_s11 }
 0x24f   :  { %3216 = vrot.lane.b32.xlu1 %v5655_v16, %s5349_s11  ;;  %3360 = vrot.lane.b32.xlu0 %v5691_v24, %s5349_s11 }
 0x253   :  { %3312 = vrot.lane.b32.xlu1 %v5676_v21, %s5349_s11 }
 0x257   :  { %3408 = vrot.lane.b32.xlu1 %v5710_v34, %s5349_s11 }
 0x273   :  { %v297_v45 = vpop.f32.mrb[4].mxu1 }
 0x274   :  { %v4623_v48 = vpop.f32.mrb[5].mxu1  ;;  %v5919_v16 = vmul.f32 0.35355338, %v297_v45 }
 0x275   :  { %v300_v53 = vpop.f32.mrb[6].mxu1 }
 0x276   :  { %v4624_v55 = vpop.f32.mrb[7].mxu1 }
 0x279   :  { %v1442_v56 = vpop.permute.xlu0 %1441 }
 0x27a   :  { %v1447_v57 = vsel %vm256_vm2, %v1442_v56, 0 }
 0x27b   :  { %v345_v58 = vpop.f32.mrb[8].mxu1  ;;  %4764 = vmatpush3.bf16.xpose.msra.mxu0 %v1447_v57 }
 0x27c   :  { %v4629_v60 = vpop.f32.mrb[9].mxu1  ;;  %4775 = vmatprep.subr.bf16.mxu0 %v6697_v31  ;;  %v5941_v54 = vmul.f32 0.35355338, %v345_v58 }
 0x27d   :  { %v348_v0 = vpop.f32.mrb[10].mxu1  ;;  %v1492_v1 = vpop.permute.xlu1 %1491 }
 0x27e   :  { %v1497_v2 = vsel %vm256_vm2, %v1492_v1, 0  ;;  %v4630_v6 = vpop.f32.mrb[11].mxu1  ;;  %v1874_v36 = vsel %vm256_vm2, %v5941_v54, -inf }
 0x27f   :  { %v393_v8 = vpop.f32.mrb[4].mxu0  ;;  %4770 = vmatpush3.bf16.xpose.msra.mxu1 %v1497_v2 }
 0x280   :  { %v5916_v9 = vmul.f32 0.35355338, %v393_v8  ;;  %v4635_v10 = vpop.f32.mrb[5].mxu0  ;;  %4781 = vmatprep.subr.bf16.mxu1 %v6697_v31 }
 0x281   :  { %v396_v11 = vpop.f32.mrb[6].mxu0  ;;  %v1542_v15 = vpop.permute.xlu0 %1541 }
 0x282   :  { %v1547_v18 = vsel %vm256_vm2, %v1542_v15, 0  ;;  %v4636_v19 = vpop.f32.mrb[7].mxu0  ;;  %4766 = vmatmul.mubr.msk.bf16.vlgmr.msra.gmra.mrb[48].mxu0 %vm256_vm2, %v5705_v29  ;;  %v1877_v21 = vsel %vm256_vm2, %v5916_v9, -inf  ;;  %v1871_v29 = vsel %vm256_vm2, %v5919_v16, -inf }
 0x283   :  { %v441_v22 = vpop.f32.mrb[12].mxu1  ;;  %1878 = vmax.xlane.f32.xlu0 %v1877_v21  ;;  %4776 = vmatpush3.bf16.xpose.msra.mxu0 %v1547_v18 }
 0x284   :  { %v4641_v24 = vpop.f32.mrb[13].mxu1  ;;  %4777 = vmatprep.mubr.msk.bf16.mxu0 %vm5357_vm1, %v6697_v31  ;;  %4787 = vmatprep.subr.bf16.mxu0 %v6697_v31  ;;  %v5929_v5 = vmul.f32 0.35355338, %v441_v22 }
 0x285   :  { %v444_v34 = vpop.f32.mrb[14].mxu1  ;;  %v1592_v3 = vpop.permute.xlu1 %1591 }
 0x286   :  { %v1597_v44 = vsel %vm256_vm2, %v1592_v3, 0  ;;  %v4642_v12 = vpop.f32.mrb[15].mxu1  ;;  %4772 = vmatmul.mubr.msk.bf16.vlgmr.msra.gmra.mrb[56].mxu1 %vm256_vm2, %v5715_v38  ;;  %v1880_v62 = vsel %vm256_vm2, %v5929_v5, -inf }
 0x287   :  { %v489_v14 = vpop.f32.mrb[8].mxu0  ;;  %4782 = vmatpush3.bf16.xpose.msra.mxu1 %v1597_v44  ;;  %1872 = vmax.xlane.f32.xlu0 %v1871_v29 }
 0x288   :  { %v5936_v20 = vmul.f32 0.35355338, %v489_v14  ;;  %v4647_v43 = vpop.f32.mrb[9].mxu0  ;;  %4783 = vmatprep.mubr.msk.bf16.mxu1 %vm5357_vm1, %v6697_v31  ;;  %4793 = vmatprep.subr.bf16.mxu1 %v6697_v31 }
 0x289   :  { %v492_v26 = vpop.f32.mrb[10].mxu0  ;;  %v1642_v30 = vpop.permute.xlu0 %1641 }
 0x28a   :  { %v1647_v38 = vsel %vm256_vm2, %v1642_v30, 0  ;;  %v4648_v46 = vpop.f32.mrb[11].mxu0  ;;  %4778 = vmatmul.mubr.msk.bf16.vlgmr.msra.gmra.mrb[52].mxu0 %vm256_vm2, %v5729_v61  ;;  %v1883_v59 = vsel %vm256_vm2, %v5936_v20, -inf }
 0x28b   :  { %v537_v33 = vpop.f32.mrb[16].mxu1  ;;  %1884 = vmax.xlane.f32.xlu1 %v1883_v59  ;;  %1881 = vmax.xlane.f32.xlu0 %v1880_v62 }
 0x28c   :  { %v5950_v49 = vmul.f32 0.35355338, %v537_v33  ;;  %4788 = vmatpush3.bf16.xpose.msra.mxu0 %v1647_v38  ;;  %v4653_v27 = vpop.f32.mrb[17].mxu1  ;;  %4789 = vmatprep.mubr.msk.bf16.mxu0 %vm5357_vm1, %v6697_v31 }
 0x28d   :  { %v540_v32 = vpop.f32.mrb[18].mxu1  ;;  %v1692_v23 = vpop.permute.xlu1 %1691  ;;  %4799 = vmatprep.subr.bf16.mxu0 %v6697_v31 }
 0x28e   :  { %v1697_v61 = vsel %vm256_vm2, %v1692_v23, 0  ;;  %v4654_v35 = vpop.f32.mrb[19].mxu1  ;;  %4784 = vmatmul.mubr.msk.bf16.vlgmr.msra.gmra.mrb[60].mxu1 %vm256_vm2, %v5743_v41  ;;  %v1886_v39 = vsel %vm256_vm2, %v5950_v49, -inf }
 0x28f   :  { %v585_v37 = vpop.f32.mrb[12].mxu0  ;;  %4794 = vmatpush3.bf16.xpose.msra.mxu1 %v1697_v61  ;;  %1875 = vmax.xlane.f32.xlu1 %v1874_v36 }
 0x290   :  { %v5962_v51 = vmul.f32 0.35355338, %v585_v37  ;;  %1887 = vmax.xlane.f32.xlu0 %v1886_v39  ;;  %v4659_v42 = vpop.f32.mrb[13].mxu0  ;;  %4795 = vmatprep.mubr.msk.bf16.mxu1 %vm5357_vm1, %v6697_v31 }
 0x291   :  { %v588_v45 = vpop.f32.mrb[14].mxu0  ;;  %v1742_v48 = vpop.permute.xlu0 %1741  ;;  %4805 = vmatprep.subr.bf16.mxu1 %v6697_v31 }
 0x292   :  { %v1747_v41 = vsel %vm256_vm2, %v1742_v48, 0  ;;  %v4660_v53 = vpop.f32.mrb[15].mxu0  ;;  %v1889_v55 = vsel %vm256_vm2, %v5962_v51, -inf }
 0x293   :  { %4790 = vmatmul.mubr.msk.bf16.vlgmr.msra.gmra.mrb[56].mxu0 %vm256_vm2, %v5757_v7  ;;  %v633_v56 = vpop.f32.mrb[20].mxu1  ;;  %1890 = vmax.xlane.f32.xlu1 %v1889_v55 }
 0x294   :  { %v5972_v57 = vmul.f32 0.35355338, %v633_v56  ;;  %4800 = vmatpush3.bf16.xpose.msra.mxu0 %v1747_v41  ;;  %v4665_v58 = vpop.f32.mrb[21].mxu1  ;;  %4801 = vmatprep.mubr.msk.bf16.mxu0 %vm5357_vm1, %v6697_v31 }
 0x295   :  { %v636_v60 = vpop.f32.mrb[22].mxu1  ;;  %v1792_v0 = vpop.permute.xlu1 %1791  ;;  %4811 = vmatprep.subr.bf16.mxu0 %v6697_v31 }
 0x296   :  { %v1797_v1 = vsel %vm256_vm2, %v1792_v0, 0  ;;  %v4666_v2 = vpop.f32.mrb[23].mxu1  ;;  %4796 = vmatmul.mubr.msk.bf16.vlgmr.msra.gmra.mrb[64].mxu1 %vm256_vm2, %v5771_v40  ;;  %v1892_v7 = vsel %vm256_vm2, %v5972_v57, -inf  ;;  %v2305_v10 = vpop.permute.xlu0 %2304 }
 0x297   :  { %4806 = vmatpush3.bf16.xpose.msra.mxu1 %v1797_v1  ;;  %1893 = vmax.xlane.f32.xlu0 %v1892_v7  ;;  %v2310_v40 = vsel %vm2260_vm3, %v2305_v10, 0 }
 0x298   :  { %4807 = vmatprep.mubr.msk.bf16.mxu1 %vm5357_vm1, %v6697_v31  ;;  %4817 = vmatprep.subr.bf16.mxu1 %v6697_v31 }
 0x299   :  { %v2256_v6 = vpop.permute.xlu1 %2255 }
 0x29a   :  { %v2262_v8 = vsel %vm2260_vm3, %v2256_v6, 0  ;;  %v6001_v15 = vpop.permute.xlu0 %2400 }
 0x29b   :  { %4802 = vmatmul.mubr.msk.bf16.vlgmr.msra.gmra.mrb[60].mxu0 %vm256_vm2, %v5785_v25 }
 0x29c   :  { %4812 = vmatpush3.bf16.msra.mxu0 %v2262_v8  ;;  %4813 = vmatprep.mubr.msk.bf16.mxu0 %vm5357_vm1, %v6697_v31 }
 0x29d   :  { %4823 = vmatprep.subr.bf16.mxu0 %v6697_v31  ;;  %v5997_v11 = vpop.permute.xlu1 %2352 }
 0x29e   :  { %4808 = vmatmul.mubr.msk.bf16.vlgmr.msra.gmra.mrb[68].mxu1 %vm256_vm2, %v5799_v47  ;;  %v6011_v29 = vpop.permute.xlu0 %2496 }
 0x29f   :  { %4818 = vmatpush3.bf16.msra.mxu1 %v2310_v40  ;;  %4819 = vmatprep.mubr.msk.bf16.mxu1 %vm5357_vm1, %v6697_v31 }
 0x2a0   :  { %4829 = vmatprep.subr.bf16.mxu1 %v6697_v31 }
 0x2a1   :  { %v5999_v25 = vpop.permute.xlu1 %2448 }
 0x2a2   :  { %v6021_v32 = vpop.permute.xlu0 %2592 }
 0x2a5   :  { %v6007_v34 = vpop.permute.xlu1 %2544 }
 0x2a6   :  { %v6031_v53 = vpop.permute.xlu0 %2784 }
 0x2a9   :  { %v6017_v59 = vpop.permute.xlu1 %2640 }
 0x2aa   :  { %v6041_v10 = vpop.permute.xlu0 %2976 }
 0x2ad   :  { %v6027_v42 = vpop.permute.xlu1 %2736 }
 0x2b1   :  { %v6037_v2 = vpop.permute.xlu1 %2832 }
 0x2dc   :  { %v683_v18 = vpop.f32.mrb[16].mxu0 }
 0x2dd   :  { %v6003_v19 = vmul.f32 0.35355338, %v683_v18  ;;  %v4671_v21 = vpop.f32.mrb[17].mxu0 }
 0x2de   :  { %v686_v22 = vpop.f32.mrb[18].mxu0 }
 0x2df   :  { %v4672_v24 = vpop.f32.mrb[19].mxu0  ;;  %v1895_v47 = vsel %vm256_vm2, %v6003_v19, -inf }
 0x2e0   :  { %v733_v3 = vpop.f32.mrb[24].mxu1  ;;  %1896 = vmax.xlane.f32.xlu1 %v1895_v47 }
 0x2e1   :  { %v6009_v44 = vmul.f32 0.35355338, %v733_v3  ;;  %v4677_v12 = vpop.f32.mrb[25].mxu1  ;;  %v6047_v3 = vpop.permute.xlu1 %2928 }
 0x2e2   :  { %v736_v14 = vpop.f32.mrb[26].mxu1 }
 0x2e3   :  { %v4678_v43 = vpop.f32.mrb[27].mxu1  ;;  %v1898_v26 = vsel %vm256_vm2, %v6009_v44, -inf }
 0x2e4   :  { %v783_v30 = vpop.f32.mrb[20].mxu0  ;;  %1899 = vmax.xlane.f32.xlu0 %v1898_v26  ;;  %v6051_v26 = vpop.permute.xlu0 %3168 }
 0x2e5   :  { %v6015_v38 = vmul.f32 0.35355338, %v783_v30  ;;  %v4683_v46 = vpop.f32.mrb[21].mxu0  ;;  %6703 = vst [vmem:[#allocation14_spill] sm:$0xff] %v6051_v26 }
 0x2e6   :  { %v786_v62 = vpop.f32.mrb[22].mxu0 }
 0x2e7   :  { %v4684_v33 = vpop.f32.mrb[23].mxu0  ;;  %v1901_v27 = vsel %vm256_vm2, %v6015_v38, -inf }
 0x2e8   :  { %v833_v23 = vpop.f32.mrb[28].mxu1  ;;  %1902 = vmax.xlane.f32.xlu1 %v1901_v27 }
 0x2e9   :  { %v6023_v61 = vmul.f32 0.35355338, %v833_v23  ;;  %v4689_v35 = vpop.f32.mrb[29].mxu1  ;;  %v6055_v23 = vpop.permute.xlu1 %3024 }
 0x2ea   :  { %v836_v36 = vpop.f32.mrb[30].mxu1 }
 0x2eb   :  { %v4690_v39 = vpop.f32.mrb[31].mxu1  ;;  %v1904_v37 = vsel %vm256_vm2, %v6023_v61, -inf }
 0x2ec   :  { %v883_v45 = vpop.f32.mrb[24].mxu0  ;;  %1905 = vmax.xlane.f32.xlu0 %v1904_v37  ;;  %v6057_v39 = vpop.permute.xlu0 %2688 }
 0x2ed   :  { %v6029_v48 = vmul.f32 0.35355338, %v883_v45  ;;  %v4695_v41 = vpop.f32.mrb[25].mxu0 }
 0x2ee   :  { %v886_v55 = vpop.f32.mrb[26].mxu0 }
 0x2ef   :  { %v4696_v56 = vpop.f32.mrb[27].mxu0  ;;  %v1907_v58 = vsel %vm256_vm2, %v6029_v48, -inf }
 0x2f0   :  { %v933_v60 = vpop.f32.mrb[32].mxu1  ;;  %1908 = vmax.xlane.f32.xlu1 %v1907_v58  ;;  %v6059_v56 = vpop.permute.xlu1 %3120 }
 0x2f1   :  { %v6035_v0 = vmul.f32 0.35355338, %v933_v60  ;;  %v4701_v1 = vpop.f32.mrb[33].mxu1  ;;  %6704 = vst [vmem:[#allocation15_spill] sm:$0xff] %v6059_v56 }
 0x2f2   :  { %v936_v7 = vpop.f32.mrb[34].mxu1  ;;  %v6061_v1 = vpop.permute.xlu0 %2880 }
 0x2f3   :  { %v4702_v6 = vpop.f32.mrb[35].mxu1  ;;  %v1910_v8 = vsel %vm256_vm2, %v6035_v0, -inf }
 0x2f4   :  { %v983_v40 = vpop.f32.mrb[28].mxu0  ;;  %1911 = vmax.xlane.f32.xlu0 %v1910_v8 }
 0x2f5   :  { %v6043_v18 = vmul.f32 0.35355338, %v983_v40  ;;  %v4707_v21 = vpop.f32.mrb[29].mxu0 }
 0x2f6   :  { %v986_v22 = vpop.f32.mrb[30].mxu0  ;;  %v6065_v21 = vpop.permute.xlu1 %3216 }
 0x2f7   :  { %v4708_v24 = vpop.f32.mrb[31].mxu0  ;;  %v1913_v47 = vsel %vm256_vm2, %v6043_v18, -inf  ;;  %6705 = vst [vmem:[#allocation16_spill] sm:$0xff] %v6065_v21 }
 0x2f8   :  { %v1033_v12 = vpop.f32.mrb[36].mxu1  ;;  %1914 = vmax.xlane.f32.xlu1 %v1913_v47  ;;  %v6067_v47 = vpop.permute.xlu0 %3072 }
 0x2f9   :  { %v6049_v14 = vmul.f32 0.35355338, %v1033_v12  ;;  %v4713_v43 = vpop.f32.mrb[37].mxu1 }
 0x2fa   :  { %v1036_v30 = vpop.f32.mrb[38].mxu1 }
 0x2fb   :  { %v4714_v46 = vpop.f32.mrb[39].mxu1  ;;  %v1916_v62 = vsel %vm256_vm2, %v6049_v14, -inf }
 0x2fc   :  { %1917 = vmax.xlane.f32.xlu0 %v1916_v62  ;;  %v1083_v33 = vpop.f32.mrb[32].mxu0  ;;  %v6073_v62 = vpop.permute.xlu1 %3312 }
 0x2fd   :  { %v4719_v27 = vpop.f32.mrb[33].mxu0  ;;  %6706 = vst [vmem:[#allocation17_spill] sm:$0xff] %v6073_v62 }
 0x2fe   :  { %v1086_v35 = vpop.f32.mrb[34].mxu0 }
 0x2ff   :  { %v4720_v36 = vpop.f32.mrb[35].mxu0 }
 0x300   :  { %v1133_v37 = vpop.f32.mrb[40].mxu1  ;;  %v6075_v36 = vpop.permute.xlu0 %3264 }
 0x301   :  { %v4725_v45 = vpop.f32.mrb[41].mxu1  ;;  %6707 = vst [vmem:[#allocation18_spill] sm:$0xff] %v6075_v36 }
 0x302   :  { %v1136_v41 = vpop.f32.mrb[42].mxu1 }
 0x303   :  { %v4726_v55 = vpop.f32.mrb[43].mxu1 }
 0x304   :  { %v1183_v58 = vpop.f32.mrb[36].mxu0 }
 0x305   :  { %v4731_v60 = vpop.f32.mrb[37].mxu0 }
 0x306   :  { %v1186_v7 = vpop.f32.mrb[38].mxu0  ;;  %v6081_v60 = vpop.permute.xlu1 %3408 }
 0x307   :  { %v4732_v6 = vpop.f32.mrb[39].mxu0  ;;  %6708 = vst [vmem:[#allocation19_spill] sm:$0xff] %v6081_v60 }
 0x308   :  { %v1233_v8 = vpop.f32.mrb[44].mxu1  ;;  %v6083_v6 = vpop.permute.xlu0 %3360 }
 0x309   :  { %v4737_v40 = vpop.f32.mrb[45].mxu1  ;;  %3504 = vrot.lane.b32.xlu1 %v5734_v63, %s5349_s11  ;;  %6709 = vst [vmem:[#allocation20_spill] sm:$0xff] %v6083_v6 }
 0x30a   :  { %v1236_v22 = vpop.f32.mrb[46].mxu1 }
 0x30b   :  { %v4738_v24 = vpop.f32.mrb[47].mxu1 }
 0x30c   :  { %v6069_v12 = vpop.f32.mrb[40].mxu0 }
 0x30d   :  { %3552 = vrot.lane.b32.xlu1 %v5747_v4, %s5349_s11  ;;  %v4743_v43 = vpop.f32.mrb[41].mxu0 }
 0x30e   :  { %v1286_v30 = vpop.f32.mrb[42].mxu0 }
 0x30f   :  { %v4744_v46 = vpop.f32.mrb[43].mxu0 }
 0x310   :  { %v1333_v27 = vpop.f32.mrb[48].mxu1  ;;  %v1879_v46 = vpop.xlane.xlu0 %1878 }
 0x311   :  { %v4749_v35 = vpop.f32.mrb[49].mxu1 }
 0x312   :  { %v1336_v63 = vpop.f32.mrb[50].mxu1  ;;  %3456 = vrot.lane.b32.xlu0 %v5719_v52, %s5349_s11 }
 0x313   :  { %v4750_v45 = vpop.f32.mrb[51].mxu1  ;;  %v1969_v63 = vsub.f32 %v5916_v9, %v1879_v46  ;;  %v6094_v46 = vmul.f32 0.35355338, %v1183_v58 }
 0x314   :  { %v6079_v41 = vpop.f32.mrb[44].mxu0  ;;  %v1873_v52 = vpop.xlane.xlu0 %1872 }
 0x315   :  { %v4755_v55 = vpop.f32.mrb[45].mxu0  ;;  %v2003_v31 = vmul.f32 1.442695, %v1969_v63  ;;  %v6112_v63 = vmul.f32 0.35355338, %v1333_v27 }
 0x316   :  { %v1386_v4 = vpop.f32.mrb[46].mxu0  ;;  %v1967_v55 = vsub.f32 %v5919_v16, %v1873_v52 }
 0x317   :  { %v4756_v7 = vpop.f32.mrb[47].mxu0  ;;  %5102 = vpow2.f32 %v2003_v31 }
 0x318   :  { %v1433_v40 = vpop.f32.mrb[52].mxu1  ;;  %v1885_v24 = vpop.xlane.xlu1 %1884  ;;  %v1999_v7 = vmul.f32 1.442695, %v1967_v55 }
 0x319   :  { %v4761_v22 = vpop.f32.mrb[53].mxu1  ;;  %v1882_v4 = vpop.xlane.xlu0 %1881  ;;  %v1971_v9 = vsub.f32 %v5936_v20, %v1885_v24 }
 0x31a   :  { %v1436_v43 = vpop.f32.mrb[54].mxu1  ;;  %v1970_v6 = vsub.f32 %v5929_v5, %v1882_v4  ;;  %v6089_v22 = vmul.f32 0.35355338, %v1083_v33  ;;  %v6121_v4 = vmul.f32 0.35355338, %v6069_v12 }
 0x31b   :  { %v4762_v30 = vpop.f32.mrb[55].mxu1  ;;  %v6091_v43 = vmul.f32 0.35355338, %v1133_v37  ;;  %v2007_v33 = vmul.f32 1.442695, %v1971_v9 }
 0x31c   :  { %v1876_v35 = vpop.xlane.xlu1 %1875  ;;  %v2005_v30 = vmul.f32 1.442695, %v1970_v6  ;;  %v1919_v5 = vsel %vm256_vm2, %v6089_v22, -inf  ;;  %v6129_v9 = vmul.f32 0.35355338, %v1433_v40 }
 0x31d   :  { %v1968_v45 = vsub.f32 %v5941_v54, %v1876_v35  ;;  %v6096_v54 = vmul.f32 0.35355338, %v1233_v8  ;;  %v1888_v16 = vpop.xlane.xlu0 %1887  ;;  %v1922_v31 = vsel %vm256_vm2, %v6091_v43, -inf  ;;  %v1925_v8 = vsel %vm256_vm2, %v6094_v46, -inf }
 0x31e   :  { %v1972_v37 = vsub.f32 %v5950_v49, %v1888_v16  ;;  %v1940_v40 = vsel %vm256_vm2, %v6129_v9, -inf }
 0x31f   :  { %v2001_v60 = vmul.f32 1.442695, %v1968_v45  ;;  %v1928_v58 = vsel %vm256_vm2, %v6096_v54, -inf }
 0x320   :  { %v1891_v20 = vpop.xlane.xlu1 %1890  ;;  %v2009_v24 = vmul.f32 1.442695, %v1972_v37 }
 0x321   :  { %5104 = vpow2.f32 %v2001_v60  ;;  %v6103_v60 = vpop.eup %5102  ;;  %v1973_v35 = vsub.f32 %v5962_v51, %v1891_v20  ;;  %v1934_v51 = vsel %vm256_vm2, %v6112_v63, -inf }
 0x322   :  { %5106 = vpow2.f32 %v1999_v7  ;;  %v2069_v52 = vsel %vm256_vm2, %v6103_v60, 0.0 }
 0x323   :  { %5108 = vpow2.f32 %v2005_v30  ;;  %v2011_v55 = vmul.f32 1.442695, %v1973_v35  ;;  %v1931_v30 = vsel %vm256_vm2, %v6121_v4, -inf }
 0x324   :  { %5110 = vpow2.f32 %v2007_v33  ;;  %v1894_v37 = vpop.xlane.xlu0 %1893 }
 0x325   :  { %5112 = vpow2.f32 %v2009_v24 }
 0x326   :  { %5114 = vpow2.f32 %v2011_v55 }
 0x32b   :  { %v6109_v6 = vpop.eup %5104 }
 0x32c   :  { %v2066_v49 = vsel %vm256_vm2, %v6109_v6, 0.0  ;;  %v6118_v45 = vpop.eup %5106 }
 0x32d   :  { %v2063_v27 = vsel %vm256_vm2, %v6118_v45, 0.0  ;;  %v6127_v7 = vpop.eup %5108 }
 0x32e   :  { %v2072_v12 = vsel %vm256_vm2, %v6127_v7, 0.0  ;;  %v6135_v16 = vpop.eup %5110 }
 0x32f   :  { %v6144_v33 = vpop.eup %5112 }
 0x331   :  { %1923 = vmax.xlane.f32.xlu0 %v1922_v31  ;;  %1920 = vmax.xlane.f32.xlu1 %v1919_v5  ;;  %v6138_v31 = vmul.f32 0.35355338, %v6079_v41  ;;  %v2075_v5 = vsel %vm256_vm2, %v6135_v16, 0.0  ;;  %v1974_v41 = vsub.f32 %v5972_v57, %v1894_v37 }
 0x333   :  { %v1937_v20 = vsel %vm256_vm2, %v6138_v31, -inf  ;;  %v2013_v35 = vmul.f32 1.442695, %v1974_v41 }
 0x335   :  { %1929 = vmax.xlane.f32.xlu0 %v1928_v58  ;;  %1926 = vmax.xlane.f32.xlu1 %v1925_v8  ;;  %v2078_v58 = vsel %vm256_vm2, %v6144_v33, 0.0  ;;  %v6150_v8 = vpop.eup %5114  ;;  %5116 = vpow2.f32 %v2013_v35 }
 0x336   :  { %v2081_v24 = vsel %vm256_vm2, %v6150_v8, 0.0 }
 0x339   :  { %2067 = vadd.xlane.f32.xlu0 %v2066_v49  ;;  %2070 = vadd.xlane.f32.xlu1 %v2069_v52 }
 0x33d   :  { %1935 = vmax.xlane.f32.xlu0 %v1934_v51  ;;  %2064 = vadd.xlane.f32.xlu1 %v2063_v27 }
 0x341   :  { %1932 = vmax.xlane.f32.xlu1 %v1931_v30  ;;  %2073 = vadd.xlane.f32.xlu0 %v2072_v12 }
 0x345   :  { %2076 = vadd.xlane.f32.xlu1 %v2075_v5  ;;  %1941 = vmax.xlane.f32.xlu0 %v1940_v40 }
 0x349   :  { %1938 = vmax.xlane.f32.xlu1 %v1937_v20  ;;  %2079 = vadd.xlane.f32.xlu0 %v2078_v58  ;;  %v6163_v58 = vpop.eup %5116 }
 0x34d   :  { %2082 = vadd.xlane.f32.xlu1 %v2081_v24 }
 0x355   :  { %v1483_v49 = vpop.f32.mrb[48].mxu0 }
 0x356   :  { %v6155_v52 = vmul.f32 0.35355338, %v1483_v49  ;;  %v4767_v55 = vpop.f32.mrb[49].mxu0 }
 0x357   :  { %v1486_v51 = vpop.f32.mrb[50].mxu0 }
 0x358   :  { %v4768_v27 = vpop.f32.mrb[51].mxu0  ;;  %v1943_v30 = vsel %vm256_vm2, %v6155_v52, -inf }
 0x359   :  { %v1533_v12 = vpop.f32.mrb[56].mxu1  ;;  %1944 = vmax.xlane.f32.xlu1 %v1943_v30  ;;  %v2084_v27 = vsel %vm256_vm2, %v6163_v58, 0.0 }
 0x35a   :  { %v6159_v5 = vmul.f32 0.35355338, %v1533_v12  ;;  %v4773_v57 = vpop.f32.mrb[57].mxu1 }
 0x35b   :  { %v1536_v40 = vpop.f32.mrb[58].mxu1 }
 0x35c   :  { %v4774_v37 = vpop.f32.mrb[59].mxu1  ;;  %v1946_v20 = vsel %vm256_vm2, %v6159_v5, -inf }
 0x35d   :  { %v1583_v41 = vpop.f32.mrb[52].mxu0  ;;  %1947 = vmax.xlane.f32.xlu0 %v1946_v20 }
 0x35e   :  { %v6165_v24 = vmul.f32 0.35355338, %v1583_v41  ;;  %v4779_v35 = vpop.f32.mrb[53].mxu0 }
 0x35f   :  { %v1586_v49 = vpop.f32.mrb[54].mxu0 }
 0x360   :  { %v4780_v55 = vpop.f32.mrb[55].mxu0  ;;  %v1949_v51 = vsel %vm256_vm2, %v6165_v24, -inf }
 0x361   :  { %v1633_v30 = vpop.f32.mrb[60].mxu1  ;;  %1950 = vmax.xlane.f32.xlu1 %v1949_v51  ;;  %2085 = vadd.xlane.f32.xlu0 %v2084_v27 }
 0x362   :  { %v6171_v12 = vmul.f32 0.35355338, %v1633_v30  ;;  %v4785_v57 = vpop.f32.mrb[61].mxu1 }
 0x363   :  { %v1636_v40 = vpop.f32.mrb[62].mxu1 }
 0x364   :  { %v4786_v37 = vpop.f32.mrb[63].mxu1  ;;  %v1952_v20 = vsel %vm256_vm2, %v6171_v12, -inf }
 0x365   :  { %1953 = vmax.xlane.f32.xlu0 %v1952_v20 }
 0x366   :  { %v1683_v41 = vpop.f32.mrb[56].mxu0 }
 0x367   :  { %v6175_v35 = vmul.f32 0.35355338, %v1683_v41  ;;  %v4791_v49 = vpop.f32.mrb[57].mxu0 }
 0x368   :  { %v1686_v55 = vpop.f32.mrb[58].mxu0 }
 0x369   :  { %v4792_v62 = vpop.f32.mrb[59].mxu0  ;;  %v1733_v36 = vpop.f32.mrb[64].mxu1  ;;  %v1955_v51 = vsel %vm256_vm2, %v6175_v35, -inf }
 0x36a   :  { %v6179_v27 = vmul.f32 0.35355338, %v1733_v36  ;;  %1956 = vmax.xlane.f32.xlu1 %v1955_v51  ;;  %v4797_v30 = vpop.f32.mrb[65].mxu1 }
 0x36b   :  { %v1736_v57 = vpop.f32.mrb[66].mxu1 }
 0x36c   :  { %v4798_v40 = vpop.f32.mrb[67].mxu1  ;;  %v1958_v37 = vsel %vm256_vm2, %v6179_v27, -inf }
 0x36d   :  { %v1897_v20 = vpop.xlane.xlu1 %1896  ;;  %1959 = vmax.xlane.f32.xlu0 %v1958_v37 }
 0x36e   :  { %v1975_v41 = vsub.f32 %v6003_v19, %v1897_v20  ;;  %v1783_v49 = vpop.f32.mrb[60].mxu0 }
 0x36f   :  { %v6184_v55 = vmul.f32 0.35355338, %v1783_v49  ;;  %v4803_v62 = vpop.f32.mrb[61].mxu0 }
 0x370   :  { %v2015_v21 = vmul.f32 1.442695, %v1975_v41  ;;  %v1786_v26 = vpop.f32.mrb[62].mxu0 }
 0x371   :  { %v4804_v56 = vpop.f32.mrb[63].mxu0  ;;  %v1833_v36 = vpop.f32.mrb[68].mxu1  ;;  %v1961_v51 = vsel %vm256_vm2, %v6184_v55, -inf }
 0x372   :  { %5118 = vpow2.f32 %v2015_v21  ;;  %v6188_v30 = vmul.f32 0.35355338, %v1833_v36  ;;  %1962 = vmax.xlane.f32.xlu1 %v1961_v51  ;;  %v1900_v57 = vpop.xlane.xlu0 %1899  ;;  %v4809_v40 = vpop.f32.mrb[69].mxu1 }
 0x373   :  { %v1976_v37 = vsub.f32 %v6009_v44, %v1900_v57  ;;  %v1836_v19 = vpop.f32.mrb[70].mxu1 }
 0x374   :  { %v4810_v20 = vpop.f32.mrb[71].mxu1  ;;  %v1964_v49 = vsel %vm256_vm2, %v6188_v30, -inf }
 0x375   :  { %v2017_v41 = vmul.f32 1.442695, %v1976_v37  ;;  %v1903_v26 = vpop.xlane.xlu1 %1902  ;;  %1965 = vmax.xlane.f32.xlu0 %v1964_v49 }
 0x376   :  { %v1977_v56 = vsub.f32 %v6015_v38, %v1903_v26 }
 0x377   :  { %5120 = vpow2.f32 %v2017_v41 }
 0x378   :  { %v2019_v62 = vmul.f32 1.442695, %v1977_v56 }
 0x379   :  { %v1906_v21 = vpop.xlane.xlu0 %1905 }
 0x37a   :  { %5122 = vpow2.f32 %v2019_v62  ;;  %v1978_v36 = vsub.f32 %v6023_v61, %v1906_v21 }
 0x37c   :  { %v6195_v51 = vpop.eup %5118  ;;  %v2021_v40 = vmul.f32 1.442695, %v1978_v36 }
 0x37d   :  { %v1909_v44 = vpop.xlane.xlu1 %1908  ;;  %v2087_v57 = vsel %vm256_vm2, %v6195_v51, 0.0 }
 0x37e   :  { %5124 = vpow2.f32 %v2021_v40  ;;  %v1979_v37 = vsub.f32 %v6029_v48, %v1909_v44  ;;  %2088 = vadd.xlane.f32.xlu1 %v2087_v57 }
 0x380   :  { %v2023_v19 = vmul.f32 1.442695, %v1979_v37 }
 0x381   :  { %v6200_v20 = vpop.eup %5120  ;;  %v1912_v38 = vpop.xlane.xlu0 %1911 }
 0x382   :  { %5126 = vpow2.f32 %v2023_v19  ;;  %v1980_v49 = vsub.f32 %v6035_v0, %v1912_v38  ;;  %v2090_v61 = vsel %vm256_vm2, %v6200_v20, 0.0 }
 0x383   :  { %2091 = vadd.xlane.f32.xlu0 %v2090_v61 }
 0x384   :  { %v6205_v41 = vpop.eup %5122  ;;  %v2025_v26 = vmul.f32 1.442695, %v1980_v49 }
 0x385   :  { %v1915_v56 = vpop.xlane.xlu1 %1914  ;;  %v2093_v62 = vsel %vm256_vm2, %v6205_v41, 0.0 }
 0x386   :  { %5128 = vpow2.f32 %v2025_v26  ;;  %v1981_v48 = vsub.f32 %v6043_v18, %v1915_v56  ;;  %2094 = vadd.xlane.f32.xlu1 %v2093_v62 }
 0x388   :  { %v6210_v21 = vpop.eup %5124  ;;  %v2027_v36 = vmul.f32 1.442695, %v1981_v48 }
 0x389   :  { %v1918_v40 = vpop.xlane.xlu0 %1917  ;;  %v2096_v0 = vsel %vm256_vm2, %v6210_v21, 0.0  ;;  %v6231_v56 = vpop.permute.xlu1 %3504 }
 0x38a   :  { %5130 = vpow2.f32 %v2027_v36  ;;  %v1982_v44 = vsub.f32 %v6049_v14, %v1918_v40  ;;  %2097 = vadd.xlane.f32.xlu0 %v2096_v0  ;;  %6710 = vst [vmem:[#allocation21_spill] sm:$0xff] %v6231_v56 }
 0x38c   :  { %v6215_v57 = vpop.eup %5126  ;;  %v2029_v37 = vmul.f32 1.442695, %v1982_v44 }
 0x38d   :  { %v2099_v19 = vsel %vm256_vm2, %v6215_v57, 0.0  ;;  %v6233_v62 = vpop.permute.xlu1 %3552  ;;  %v6235_v48 = vpop.permute.xlu0 %3456 }
 0x38e   :  { %5132 = vpow2.f32 %v2029_v37  ;;  %2100 = vadd.xlane.f32.xlu1 %v2099_v19  ;;  %6711 = vst [vmem:[#allocation22_spill] sm:$0xff] %v6233_v62  ;;  %6712 = vst [vmem:[#allocation23_spill] sm:$0xff] %v6235_v48 }
 0x390   :  { %v6219_v18 = vpop.eup %5128 }
 0x391   :  { %v2102_v38 = vsel %vm256_vm2, %v6219_v18, 0.0 }
 0x392   :  { %2103 = vadd.xlane.f32.xlu0 %v2102_v38 }
 0x394   :  { %v6223_v49 = vpop.eup %5130 }
 0x395   :  { %v2105_v14 = vsel %vm256_vm2, %v6223_v49, 0.0 }
 0x396   :  { %2106 = vadd.xlane.f32.xlu1 %v2105_v14 }
 0x398   :  { %v6227_v61 = vpop.eup %5132 }
 0x399   :  { %v2108_v26 = vsel %vm256_vm2, %v6227_v61, 0.0 }
 0x39a   :  { %2109 = vadd.xlane.f32.xlu0 %v2108_v26 }
 0x3be   :  { %v1921_v36 = vpop.xlane.xlu1 %1920  ;;  %v1924_v40 = vpop.xlane.xlu0 %1923 }
 0x3bf   :  { %v1983_v0 = vsub.f32 %v6089_v22, %v1921_v36  ;;  %v1984_v44 = vsub.f32 %v6091_v43, %v1924_v40 }
 0x3c1   :  { %v2031_v37 = vmul.f32 1.442695, %v1983_v0  ;;  %v2033_v19 = vmul.f32 1.442695, %v1984_v44 }
 0x3c2   :  { %v1927_v38 = vpop.xlane.xlu1 %1926  ;;  %v1930_v14 = vpop.xlane.xlu0 %1929 }
 0x3c3   :  { %5134 = vpow2.f32 %v2031_v37  ;;  %v1985_v28 = vsub.f32 %v6094_v46, %v1927_v38  ;;  %v1986_v26 = vsub.f32 %v6096_v54, %v1930_v14 }
 0x3c4   :  { %5136 = vpow2.f32 %v2033_v19 }
 0x3c5   :  { %v2035_v56 = vmul.f32 1.442695, %v1985_v28  ;;  %v2037_v62 = vmul.f32 1.442695, %v1986_v26 }
 0x3c6   :  { %v2071_v50 = vpop.xlane.xlu1 %2070  ;;  %v2068_v48 = vpop.xlane.xlu0 %2067 }
 0x3c7   :  { %5138 = vpow2.f32 %v2035_v56 }
 0x3c8   :  { %5140 = vpow2.f32 %v2037_v62 }
 0x3c9   :  { %5142 = vrcp.f32 %v2068_v48 }
 0x3ca   :  { %v2065_v22 = vpop.xlane.xlu1 %2064  ;;  %v1936_v36 = vpop.xlane.xlu0 %1935 }
 0x3cb   :  { %5144 = vrcp.f32 %v2065_v22  ;;  %v1988_v43 = vsub.f32 %v6112_v63, %v1936_v36 }
 0x3cc   :  { %5146 = vrcp.f32 %v2071_v50 }
 0x3cd   :  { %v6242_v40 = vpop.eup %5134  ;;  %v2041_v0 = vmul.f32 1.442695, %v1988_v43 }
 0x3ce   :  { %v6244_v44 = vpop.eup %5136  ;;  %v1933_v46 = vpop.xlane.xlu1 %1932  ;;  %v2111_v28 = vsel %vm256_vm2, %v6242_v40, 0.0 }
 0x3cf   :  { %v2074_v54 = vpop.xlane.xlu0 %2073  ;;  %5148 = vpow2.f32 %v2041_v0  ;;  %v1987_v56 = vsub.f32 %v6121_v4, %v1933_v46  ;;  %2112 = vadd.xlane.f32.xlu1 %v2111_v28  ;;  %v2114_v62 = vsel %vm256_vm2, %v6244_v44, 0.0 }
 0x3d0   :  { %5150 = vrcp.f32 %v2074_v54  ;;  %2115 = vadd.xlane.f32.xlu0 %v2114_v62 }
 0x3d1   :  { %v6251_v63 = vpop.eup %5138  ;;  %v2039_v48 = vmul.f32 1.442695, %v1987_v56 }
 0x3d2   :  { %v6253_v37 = vpop.eup %5140  ;;  %v2077_v50 = vpop.xlane.xlu1 %2076  ;;  %v2117_v38 = vsel %vm256_vm2, %v6251_v63, 0.0 }
 0x3d3   :  { %v1942_v19 = vpop.xlane.xlu0 %1941  ;;  %5152 = vpow2.f32 %v2039_v48  ;;  %2118 = vadd.xlane.f32.xlu1 %v2117_v38  ;;  %v2120_v4 = vsel %vm256_vm2, %v6253_v37, 0.0  ;;  %v5143_v26 = vpop.eup %5142 }
 0x3d4   :  { %v1990_v14 = vsub.f32 %v6129_v9, %v1942_v19  ;;  %2121 = vadd.xlane.f32.xlu0 %v2120_v4  ;;  %v2192_v36 = vmul.f32 %v5143_v26, %v6109_v6  ;;  %5154 = vrcp.f32 %v2077_v50  ;;  %v2406_v19 = vsel %vm2260_vm3, %v6001_v15, 0 }
 0x3d5   :  { %v5145_v22 = vpop.eup %5144  ;;  %v6713_v4 = vmov 0.0  }
 0x3d6   :  { %v2045_v43 = vmul.f32 1.442695, %v1990_v14  ;;  %v2191_v0 = vmul.f32 %v5145_v22, %v6118_v45  ;;  %v1939_v46 = vpop.xlane.xlu1 %1938  ;;  %v2224_v56 = vpack.c.bf16 %v2192_v36, %v2192_v36  ;;  %v5147_v9 = vpop.eup %5146  ;;  %v2358_v45 = vsel %vm2260_vm3, %v5997_v11, 0 }
 0x3d7   :  { %v2080_v54 = vpop.xlane.xlu0 %2079  ;;  %v1989_v28 = vsub.f32 %v6138_v31, %v1939_v46  ;;  %v2193_v15 = vmul.f32 %v5147_v9, %v6103_v60  ;;  %v2454_v46 = vsel %vm2260_vm3, %v5999_v25, 0 }
 0x3d8   :  { %5156 = vpow2.f32 %v2045_v43  ;;  %v2223_v62 = vpack.c.bf16 %v2191_v0, %v2191_v0  ;;  %4820 = vmatmul.mubr.msk.bf16.vlgmr.msra.gmra.mrb[72].mxu1 %vm256_vm2, %v2224_v56  ;;  %v2502_v43 = vsel %vm2260_vm3, %v6011_v29, 0 }
 0x3d9   :  { %5158 = vrcp.f32 %v2080_v54  ;;  %v6263_v48 = vpop.eup %5148  ;;  %v2043_v38 = vmul.f32 1.442695, %v1989_v28  ;;  %4830 = vmatpush3.bf16.msra.mxu1 %v2406_v19  ;;  %4831 = vmatprep.mubr.msk.bf16.mxu1 %vm5357_vm1, %v6713_v4  ;;  %v2225_v22 = vpack.c.bf16 %v2193_v15, %v2193_v15 }
 0x3da   :  { %v5151_v6 = vpop.eup %5150  ;;  %4814 = vmatmul.mubr.msk.bf16.vlgmr.msra.gmra.mrb[64].mxu0 %vm256_vm2, %v2223_v62  ;;  %v2126_v31 = vsel %vm256_vm2, %v6263_v48, 0.0  ;;  %v2083_v14 = vpop.xlane.xlu1 %2082  ;;  %4841 = vmatprep.subr.bf16.mxu1 %v6713_v4 }
 0x3db   :  { %v2194_v50 = vmul.f32 %v5151_v6, %v6127_v7  ;;  %5160 = vpow2.f32 %v2043_v38  ;;  %4824 = vmatpush3.bf16.msra.mxu0 %v2358_v45  ;;  %2127 = vadd.xlane.f32.xlu0 %v2126_v31  ;;  %v2598_v38 = vsel %vm2260_vm3, %v6021_v32, 0  ;;  %v2550_v45 = vsel %vm2260_vm3, %v6007_v34, 0 }
 0x3dc   :  { %4825 = vmatprep.mubr.msk.bf16.mxu0 %vm5357_vm1, %v6713_v4  ;;  %4835 = vmatprep.subr.bf16.mxu0 %v6713_v4  ;;  %5162 = vrcp.f32 %v2083_v14 }
 0x3dd   :  { %v6278_v11 = vpop.eup %5152  ;;  %v2226_v26 = vpack.c.bf16 %v2194_v50, %v2194_v50 }
 0x3de   :  { %v2123_v7 = vsel %vm256_vm2, %v6278_v11, 0.0  ;;  %v5155_v60 = vpop.eup %5154 }
 0x3df   :  { %2124 = vadd.xlane.f32.xlu1 %v2123_v7  ;;  %v2195_v56 = vmul.f32 %v5155_v60, %v6135_v16  ;;  %v2646_v7 = vsel %vm2260_vm3, %v6017_v59, 0 }
 0x3e0   :  { %4832 = vmatmul.mubr.msk.bf16.vlgmr.msra.gmra.mrb[76].mxu1 %vm256_vm2, %v2226_v26 }
 0x3e1   :  { %4842 = vmatpush3.bf16.msra.mxu1 %v2502_v43  ;;  %4843 = vmatprep.mubr.msk.bf16.mxu1 %vm5357_vm1, %v6713_v4  ;;  %v2227_v16 = vpack.c.bf16 %v2195_v56, %v2195_v56 }
 0x3e2   :  { %v6285_v36 = vpop.eup %5156  ;;  %4826 = vmatmul.mubr.msk.bf16.vlgmr.msra.gmra.mrb[68].mxu0 %vm256_vm2, %v2225_v22  ;;  %4853 = vmatprep.subr.bf16.mxu1 %v6713_v4 }
 0x3e3   :  { %v5159_v0 = vpop.eup %5158  ;;  %v2132_v54 = vsel %vm256_vm2, %v6285_v36, 0.0  ;;  %4836 = vmatpush3.bf16.msra.mxu0 %v2454_v46  ;;  %4837 = vmatprep.mubr.msk.bf16.mxu0 %vm5357_vm1, %v6713_v4 }
 0x3e4   :  { %v2196_v28 = vmul.f32 %v5159_v0, %v6144_v33  ;;  %2133 = vadd.xlane.f32.xlu0 %v2132_v54  ;;  %4847 = vmatprep.subr.bf16.mxu0 %v6713_v4 }
 0x3e5   :  { %v6300_v29 = vpop.eup %5160 }
 0x3e6   :  { %v2228_v25 = vpack.c.bf16 %v2196_v28, %v2196_v28  ;;  %v1945_v9 = vpop.xlane.xlu1 %1944  ;;  %v2129_v33 = vsel %vm256_vm2, %v6300_v29, 0.0  ;;  %v5163_v19 = vpop.eup %5162 }
 0x3e7   :  { %v1991_v62 = vsub.f32 %v6155_v52, %v1945_v9  ;;  %2130 = vadd.xlane.f32.xlu1 %v2129_v33  ;;  %v2197_v50 = vmul.f32 %v5163_v19, %v6150_v8 }
 0x3e8   :  { %4844 = vmatmul.mubr.msk.bf16.vlgmr.msra.gmra.mrb[80].mxu1 %vm256_vm2, %v2228_v25  ;;  %v2694_v25 = vsel %vm2260_vm3, %v6057_v39, 0 }
 0x3e9   :  { %v2047_v6 = vmul.f32 1.442695, %v1991_v62  ;;  %4854 = vmatpush3.bf16.msra.mxu1 %v2598_v38  ;;  %4855 = vmatprep.mubr.msk.bf16.mxu1 %vm5357_vm1, %v6713_v4 }
 0x3ea   :  { %4838 = vmatmul.mubr.msk.bf16.vlgmr.msra.gmra.mrb[72].mxu0 %vm256_vm2, %v2227_v16  ;;  %v1948_v31 = vpop.xlane.xlu0 %1947  ;;  %4865 = vmatprep.subr.bf16.mxu1 %v6713_v4 }
 0x3eb   :  { %5164 = vpow2.f32 %v2047_v6  ;;  %4848 = vmatpush3.bf16.msra.mxu0 %v2550_v45  ;;  %v1992_v52 = vsub.f32 %v6159_v5, %v1948_v31  ;;  %4849 = vmatprep.mubr.msk.bf16.mxu0 %vm5357_vm1, %v6713_v4  ;;  %v2229_v5 = vpack.c.bf16 %v2197_v50, %v2197_v50 }
 0x3ec   :  { %4859 = vmatprep.subr.bf16.mxu0 %v6713_v4 }
 0x3ed   :  { %v2049_v32 = vmul.f32 1.442695, %v1992_v52 }
 0x3ee   :  { %v1951_v34 = vpop.xlane.xlu1 %1950  ;;  %v2086_v15 = vpop.xlane.xlu0 %2085 }
 0x3ef   :  { %5166 = vpow2.f32 %v2049_v32  ;;  %v1993_v14 = vsub.f32 %v6165_v24, %v1951_v34  ;;  %v2742_v34 = vsel %vm2260_vm3, %v6027_v42, 0  ;;  %v2790_v42 = vsel %vm2260_vm3, %v6031_v53, 0 }
 0x3f0   :  { %5168 = vrcp.f32 %v2086_v15 }
 0x3f1   :  { %v2051_v26 = vmul.f32 1.442695, %v1993_v14 }
 0x3f2   :  { %4850 = vmatmul.mubr.msk.bf16.vlgmr.msra.gmra.mrb[76].mxu0 %vm256_vm2, %v2229_v5  ;;  %v1954_v8 = vpop.xlane.xlu0 %1953 }
 0x3f3   :  { %5170 = vpow2.f32 %v2051_v26  ;;  %4860 = vmatpush3.bf16.msra.mxu0 %v2646_v7  ;;  %v1994_v60 = vsub.f32 %v6171_v12, %v1954_v8  ;;  %4861 = vmatprep.mubr.msk.bf16.mxu0 %vm5357_vm1, %v6713_v4 }
 0x3f4   :  { %4871 = vmatprep.subr.bf16.mxu0 %v6713_v4 }
 0x3f5   :  { %v6330_v22 = vpop.eup %5164  ;;  %v2053_v24 = vmul.f32 1.442695, %v1994_v60 }
 0x3f6   :  { %v2135_v43 = vsel %vm256_vm2, %v6330_v22, 0.0 }
 0x3f7   :  { %5172 = vpow2.f32 %v2053_v24  ;;  %2136 = vadd.xlane.f32.xlu1 %v2135_v43  ;;  %v1957_v33 = vpop.xlane.xlu1 %1956 }
 0x3f9   :  { %v6334_v59 = vpop.eup %5166 }
 0x3fa   :  { %v5169_v0 = vpop.eup %5168  ;;  %v2138_v46 = vsel %vm256_vm2, %v6334_v59, 0.0  ;;  %v1960_v16 = vpop.xlane.xlu0 %1959 }
 0x3fb   :  { %v2198_v12 = vmul.f32 %v5169_v0, %v6163_v58  ;;  %2139 = vadd.xlane.f32.xlu0 %v2138_v46 }
 0x3fd   :  { %v6339_v54 = vpop.eup %5170  ;;  %v2230_v28 = vpack.c.bf16 %v2198_v12, %v2198_v12  ;;  %v2886_v12 = vsel %vm2260_vm3, %v6061_v1, 0 }
 0x3fe   :  { %v2141_v56 = vsel %vm256_vm2, %v6339_v54, 0.0 }
 0x3ff   :  { %4856 = vmatmul.mubr.msk.bf16.vlgmr.msra.gmra.mrb[84].mxu1 %vm256_vm2, %v2230_v28  ;;  %2142 = vadd.xlane.f32.xlu1 %v2141_v56  ;;  %v1963_v62 = vpop.xlane.xlu1 %1962 }
 0x400   :  { %4866 = vmatpush3.bf16.msra.mxu1 %v2694_v25  ;;  %4867 = vmatprep.mubr.msk.bf16.mxu1 %vm5357_vm1, %v6713_v4  ;;  %v1997_v60 = vsub.f32 %v6184_v55, %v1963_v62 }
 0x401   :  { %v6348_v9 = vpop.eup %5172  ;;  %4877 = vmatprep.subr.bf16.mxu1 %v6713_v4 }
 0x402   :  { %v2144_v58 = vsel %vm256_vm2, %v6348_v9, 0.0  ;;  %v6353_v39 = vpop.xlane.xlu0 %1965  ;;  %v2059_v0 = vmul.f32 1.442695, %v1997_v60  ;;  %v6716_v60 = vld [vmem:[#allocation15_spill] sm:$0xff] }
 0x403   :  { %2145 = vadd.xlane.f32.xlu0 %v2144_v58 }
 0x40b   :  { %v2089_v19 = vpop.xlane.xlu1 %2088 }
 0x40c   :  { %5174 = vrcp.f32 %v2089_v19  ;;  %v3030_v19 = vsel %vm2260_vm3, %v6055_v23, 0 }
 0x410   :  { %v2092_v38 = vpop.xlane.xlu0 %2091  ;;  %3648 = vrot.lane.b32.xlu1 %v5775_v17, %s5349_s11 }
 0x411   :  { %5176 = vrcp.f32 %v2092_v38 }
 0x413   :  { %v2095_v6 = vpop.xlane.xlu1 %2094 }
 0x414   :  { %5178 = vrcp.f32 %v2095_v6 }
 0x416   :  { %v5175_v45 = vpop.eup %5174 }
 0x417   :  { %v2199_v31 = vmul.f32 %v5175_v45, %v6195_v51  ;;  %v2098_v52 = vpop.xlane.xlu0 %2097 }
 0x418   :  { %5180 = vrcp.f32 %v2098_v52 }
 0x419   :  { %3600 = vrot.lane.b32.xlu0 %v5762_v13, %s5349_s11  ;;  %v2231_v50 = vpack.c.bf16 %v2199_v31, %v2199_v31  ;;  %v1995_v13 = vsub.f32 %v6175_v35, %v1957_v33  ;;  %v2838_v35 = vsel %vm2260_vm3, %v6037_v2, 0  ;;  %v1998_v2 = vsub.f32 %v6188_v30, %v6353_v39 }
 0x41a   :  { %v2934_v30 = vsel %vm2260_vm3, %v6047_v3, 0  ;;  %v2982_v3 = vsel %vm2260_vm3, %v6041_v10, 0 }
 0x41b   :  { %v5177_v32 = vpop.eup %5176  ;;  %4862 = vmatmul.mubr.msk.bf16.vlgmr.msra.gmra.mrb[80].mxu0 %vm256_vm2, %v2231_v50  ;;  %v2101_v15 = vpop.xlane.xlu1 %2100  ;;  %v2055_v8 = vmul.f32 1.442695, %v1995_v13  ;;  %v6715_v50 = vld [vmem:[#allocation12_spill] sm:$0xff] }
 0x41c   :  { %v2200_v17 = vmul.f32 %v5177_v32, %v6200_v20  ;;  %4872 = vmatpush3.bf16.msra.mxu0 %v2742_v34  ;;  %5182 = vrcp.f32 %v2101_v15  ;;  %4873 = vmatprep.mubr.msk.bf16.mxu0 %vm5357_vm1, %v6713_v4 }
 0x41d   :  { %4883 = vmatprep.subr.bf16.mxu0 %v6713_v4 }
 0x41e   :  { %v5179_v51 = vpop.eup %5178  ;;  %v2232_v14 = vpack.c.bf16 %v2200_v17, %v2200_v17 }
 0x41f   :  { %v2201_v5 = vmul.f32 %v5179_v51, %v6205_v41  ;;  %v2104_v26 = vpop.xlane.xlu0 %2103  ;;  %v1996_v41 = vsub.f32 %v6179_v27, %v1960_v16 }
 0x420   :  { %4868 = vmatmul.mubr.msk.bf16.vlgmr.msra.gmra.mrb[88].mxu1 %vm256_vm2, %v2232_v14  ;;  %5184 = vrcp.f32 %v2104_v26 }
 0x421   :  { %4878 = vmatpush3.bf16.msra.mxu1 %v2790_v42  ;;  %v2233_v20 = vpack.c.bf16 %v2201_v5, %v2201_v5  ;;  %4879 = vmatprep.mubr.msk.bf16.mxu1 %vm5357_vm1, %v6713_v4  ;;  %v2057_v46 = vmul.f32 1.442695, %v1996_v41 }
 0x422   :  { %v5181_v7 = vpop.eup %5180  ;;  %4889 = vmatprep.subr.bf16.mxu1 %v6713_v4 }
 0x423   :  { %v2202_v53 = vmul.f32 %v5181_v7, %v6210_v21  ;;  %4874 = vmatmul.mubr.msk.bf16.vlgmr.msra.gmra.mrb[84].mxu0 %vm256_vm2, %v2233_v20  ;;  %v2107_v24 = vpop.xlane.xlu1 %2106 }
 0x424   :  { %4884 = vmatpush3.bf16.msra.mxu0 %v2838_v35  ;;  %5186 = vrcp.f32 %v2107_v24  ;;  %4885 = vmatprep.mubr.msk.bf16.mxu0 %vm5357_vm1, %v6713_v4  ;;  %v3126_v35 = vsel %vm2260_vm3, %v6716_v60, 0 }
 0x425   :  { %v2234_v43 = vpack.c.bf16 %v2202_v53, %v2202_v53  ;;  %4895 = vmatprep.subr.bf16.mxu0 %v6713_v4  ;;  %5188 = vpow2.f32 %v2055_v8  ;;  %v6717_v53 = vld [vmem:[#allocation14_spill] sm:$0xff] }
 0x426   :  { %v5183_v55 = vpop.eup %5182  ;;  %v3174_v24 = vsel %vm2260_vm3, %v6717_v53, 0 }
 0x427   :  { %v2203_v27 = vmul.f32 %v5183_v55, %v6215_v57  ;;  %v2110_v21 = vpop.xlane.xlu0 %2109  ;;  %v2061_v57 = vmul.f32 1.442695, %v1998_v2  ;;  %v6718_v2 = vld [vmem:[#allocation16_spill] sm:$0xff] }
 0x428   :  { %4880 = vmatmul.mubr.msk.bf16.vlgmr.msra.gmra.mrb[92].mxu1 %vm256_vm2, %v2234_v43  ;;  %5190 = vrcp.f32 %v2110_v21  ;;  %v6719_v21 = vld [vmem:[#allocation18_spill] sm:$0xff] }
 0x429   :  { %4890 = vmatpush3.bf16.msra.mxu1 %v2886_v12  ;;  %v2235_v28 = vpack.c.bf16 %v2203_v27, %v2203_v27  ;;  %4891 = vmatprep.mubr.msk.bf16.mxu1 %vm5357_vm1, %v6713_v4  ;;  %5192 = vpow2.f32 %v2059_v0 }
 0x42a   :  { %v5185_v56 = vpop.eup %5184  ;;  %4901 = vmatprep.subr.bf16.mxu1 %v6713_v4  ;;  %5194 = vpow2.f32 %v2057_v46 }
 0x42b   :  { %v2204_v25 = vmul.f32 %v5185_v56, %v6219_v18  ;;  %4886 = vmatmul.mubr.msk.bf16.vlgmr.msra.gmra.mrb[88].mxu0 %vm256_vm2, %v2235_v28  ;;  %5196 = vpow2.f32 %v2061_v57 }
 0x42c   :  { %4896 = vmatpush3.bf16.msra.mxu0 %v2934_v30  ;;  %4897 = vmatprep.mubr.msk.bf16.mxu0 %vm5357_vm1, %v6713_v4 }
 0x42d   :  { %v2236_v1 = vpack.c.bf16 %v2204_v25, %v2204_v25  ;;  %4907 = vmatprep.subr.bf16.mxu0 %v6713_v4 }
 0x42e   :  { %v5187_v58 = vpop.eup %5186 }
 0x42f   :  { %v2205_v33 = vmul.f32 %v5187_v58, %v6223_v49  ;;  %v6401_v62 = vpop.eup %5188 }
 0x430   :  { %4892 = vmatmul.mubr.msk.bf16.vlgmr.msra.gmra.mrb[96].mxu1 %vm256_vm2, %v2236_v1  ;;  %v2147_v10 = vsel %vm256_vm2, %v6401_v62, 0.0  ;;  %v6720_v1 = vld [vmem:[#allocation17_spill] sm:$0xff] }
 0x431   :  { %4902 = vmatpush3.bf16.msra.mxu1 %v2982_v3  ;;  %v2237_v18 = vpack.c.bf16 %v2205_v33, %v2205_v33  ;;  %4903 = vmatprep.mubr.msk.bf16.mxu1 %vm5357_vm1, %v6713_v4  ;;  %v3318_v58 = vsel %vm2260_vm3, %v6720_v1, 0  ;;  %v6721_v33 = vld [vmem:[#allocation20_spill] sm:$0xff] }
 0x432   :  { %v5191_v16 = vpop.eup %5190  ;;  %4913 = vmatprep.subr.bf16.mxu1 %v6713_v4 }
 0x433   :  { %v2206_v49 = vmul.f32 %v5191_v16, %v6227_v61  ;;  %4898 = vmatmul.mubr.msk.bf16.vlgmr.msra.gmra.mrb[92].mxu0 %vm256_vm2, %v2237_v18  ;;  %v6415_v39 = vpop.eup %5192  ;;  %v3078_v61 = vsel %vm2260_vm3, %v6067_v47, 0  ;;  %v6714_v47 = vld [vmem:[#allocation13_spill] sm:$0xff] }
 0x434   :  { %4908 = vmatpush3.bf16.msra.mxu0 %v3030_v19  ;;  %2148 = vadd.xlane.f32.xlu1 %v2147_v10  ;;  %v6417_v38 = vpop.eup %5194  ;;  %v2153_v23 = vsel %vm256_vm2, %v6415_v39, 0.0 }
 0x435   :  { %v2238_v6 = vpack.c.bf16 %v2206_v49, %v2206_v49  ;;  %4909 = vmatprep.mubr.msk.bf16.mxu0 %vm5357_vm1, %v6713_v4  ;;  %4919 = vmatprep.subr.bf16.mxu0 %v6713_v4  ;;  %v2150_v45 = vsel %vm256_vm2, %v6417_v38, 0.0  ;;  %v6429_v31 = vpop.eup %5196  ;;  %v6722_v49 = vld [vmem:[#allocation19_spill] sm:$0xff] }
 0x436   :  { %v2156_v52 = vsel %vm256_vm2, %v6429_v31, 0.0  ;;  %v3414_v10 = vsel %vm2260_vm3, %v6722_v49, 0 }
 0x438   :  { %4904 = vmatmul.mubr.msk.bf16.vlgmr.msra.gmra.mrb[100].mxu1 %vm256_vm2, %v2238_v6  ;;  %2154 = vadd.xlane.f32.xlu1 %v2153_v23  ;;  %v6723_v23 = vld [vmem:[#allocation23_spill] sm:$0xff] }
 0x439   :  { %4914 = vmatpush3.bf16.msra.mxu1 %v3078_v61  ;;  %2151 = vadd.xlane.f32.xlu0 %v2150_v45 }
 0x43a   :  { %4915 = vmatprep.mubr.msk.bf16.mxu1 %vm5357_vm1, %v6713_v4  ;;  %4925 = vmatprep.subr.bf16.mxu1 %v6713_v4 }
 0x43d   :  { %2157 = vadd.xlane.f32.xlu0 %v2156_v52 }
 0x449   :  { %3744 = vrot.lane.b32.xlu1 %v6714_v47, %s5349_s11 }
 0x453   :  { %3696 = vrot.lane.b32.xlu0 %v6715_v50, %s5349_s11 }
 0x45c   :  { %v2113_v32 = vpop.xlane.xlu1 %2112 }
 0x45d   :  { %5198 = vrcp.f32 %v2113_v32  ;;  %v2116_v34 = vpop.xlane.xlu0 %2115 }
 0x45e   :  { %5200 = vrcp.f32 %v2116_v34  ;;  %v6724_v34 = vld [vmem:[#allocation21_spill] sm:$0xff] }
 0x460   :  { %v2119_v15 = vpop.xlane.xlu1 %2118 }
 0x461   :  { %5202 = vrcp.f32 %v2119_v15  ;;  %v2122_v17 = vpop.xlane.xlu0 %2121  ;;  %v3510_v15 = vsel %vm2260_vm3, %v6724_v34, 0 }
 0x462   :  { %5204 = vrcp.f32 %v2122_v17 }
 0x467   :  { %v5199_v51 = vpop.eup %5198 }
 0x468   :  { %v5201_v13 = vpop.eup %5200  ;;  %v2207_v14 = vmul.f32 %v5199_v51, %v6242_v40  ;;  %v2128_v5 = vpop.xlane.xlu0 %2127 }
 0x469   :  { %v2208_v26 = vmul.f32 %v5201_v13, %v6244_v44  ;;  %5206 = vrcp.f32 %v2128_v5 }
 0x46a   :  { %v2239_v42 = vpack.c.bf16 %v2207_v14, %v2207_v14 }
 0x46b   :  { %v5203_v20 = vpop.eup %5202  ;;  %v2240_v7 = vpack.c.bf16 %v2208_v26, %v2208_v26 }
 0x46c   :  { %v5205_v8 = vpop.eup %5204  ;;  %4910 = vmatmul.mubr.msk.bf16.vlgmr.msra.gmra.mrb[96].mxu0 %vm256_vm2, %v2239_v42  ;;  %v2125_v41 = vpop.xlane.xlu1 %2124  ;;  %v2209_v40 = vmul.f32 %v5203_v20, %v6251_v63  ;;  %v3222_v63 = vsel %vm2260_vm3, %v6718_v2, 0 }
 0x46d   :  { %4920 = vmatpush3.bf16.msra.mxu0 %v3126_v35  ;;  %5208 = vrcp.f32 %v2125_v41  ;;  %4916 = vmatmul.mubr.msk.bf16.vlgmr.msra.gmra.mrb[104].mxu1 %vm256_vm2, %v2240_v7  ;;  %v2210_v44 = vmul.f32 %v5205_v8, %v6253_v37  ;;  %v3270_v37 = vsel %vm2260_vm3, %v6719_v21, 0 }
 0x46e   :  { %4926 = vmatpush3.bf16.msra.mxu1 %v3174_v24  ;;  %4921 = vmatprep.mubr.msk.bf16.mxu0 %vm5357_vm1, %v6713_v4  ;;  %v2241_v55 = vpack.c.bf16 %v2209_v40, %v2209_v40 }
 0x46f   :  { %4927 = vmatprep.mubr.msk.bf16.mxu1 %vm5357_vm1, %v6713_v4  ;;  %4931 = vmatprep.subr.bf16.mxu0 %v6713_v4  ;;  %v2242_v0 = vpack.c.bf16 %v2210_v44, %v2210_v44 }
 0x470   :  { %4937 = vmatprep.subr.bf16.mxu1 %v6713_v4 }
 0x471   :  { %v2134_v43 = vpop.xlane.xlu0 %2133 }
 0x472   :  { %5210 = vrcp.f32 %v2134_v43 }
 0x473   :  { %v5207_v46 = vpop.eup %5206 }
 0x474   :  { %4922 = vmatmul.mubr.msk.bf16.vlgmr.msra.gmra.mrb[100].mxu0 %vm256_vm2, %v2241_v55  ;;  %v2131_v27 = vpop.xlane.xlu1 %2130  ;;  %v2212_v28 = vmul.f32 %v5207_v46, %v6263_v48  ;;  %v3366_v48 = vsel %vm2260_vm3, %v6721_v33, 0 }
 0x475   :  { %4932 = vmatpush3.bf16.msra.mxu0 %v3222_v63  ;;  %5212 = vrcp.f32 %v2131_v27  ;;  %4928 = vmatmul.mubr.msk.bf16.vlgmr.msra.gmra.mrb[108].mxu1 %vm256_vm2, %v2242_v0 }
 0x476   :  { %4938 = vmatpush3.bf16.msra.mxu1 %v3270_v37  ;;  %4933 = vmatprep.mubr.msk.bf16.mxu0 %vm5357_vm1, %v6713_v4  ;;  %v2244_v57 = vpack.c.bf16 %v2212_v28, %v2212_v28 }
 0x477   :  { %v5209_v12 = vpop.eup %5208  ;;  %4939 = vmatprep.mubr.msk.bf16.mxu1 %vm5357_vm1, %v6713_v4  ;;  %4943 = vmatprep.subr.bf16.mxu0 %v6713_v4 }
 0x478   :  { %v2211_v56 = vmul.f32 %v5209_v12, %v6278_v11  ;;  %4949 = vmatprep.subr.bf16.mxu1 %v6713_v4 }
 0x47a   :  { %v2243_v30 = vpack.c.bf16 %v2211_v56, %v2211_v56 }
 0x47c   :  { %v5211_v25 = vpop.eup %5210  ;;  %4934 = vmatmul.mubr.msk.bf16.vlgmr.msra.gmra.mrb[104].mxu0 %vm256_vm2, %v2243_v30 }
 0x47d   :  { %4940 = vmatmul.mubr.msk.bf16.vlgmr.msra.gmra.mrb[112].mxu1 %vm256_vm2, %v2244_v57  ;;  %4944 = vmatpush3.bf16.msra.mxu0 %v3318_v58  ;;  %v2214_v3 = vmul.f32 %v5211_v25, %v6285_v36  ;;  %v3462_v36 = vsel %vm2260_vm3, %v6723_v23, 0 }
 0x47e   :  { %4950 = vmatpush3.bf16.msra.mxu1 %v3366_v48  ;;  %4945 = vmatprep.mubr.msk.bf16.mxu0 %vm5357_vm1, %v6713_v4 }
 0x47f   :  { %v5213_v11 = vpop.eup %5212  ;;  %4951 = vmatprep.mubr.msk.bf16.mxu1 %vm5357_vm1, %v6713_v4  ;;  %4955 = vmatprep.subr.bf16.mxu0 %v6713_v4  ;;  %v2246_v19 = vpack.c.bf16 %v2214_v3, %v2214_v3 }
 0x480   :  { %v2213_v18 = vmul.f32 %v5213_v11, %v6300_v29  ;;  %4961 = vmatprep.subr.bf16.mxu1 %v6713_v4 }
 0x482   :  { %v2245_v16 = vpack.c.bf16 %v2213_v18, %v2213_v18 }
 0x484   :  { %4946 = vmatmul.mubr.msk.bf16.vlgmr.msra.gmra.mrb[108].mxu0 %vm256_vm2, %v2245_v16  ;;  %v2137_v6 = vpop.xlane.xlu1 %2136 }
 0x485   :  { %4956 = vmatpush3.bf16.msra.mxu0 %v3414_v10  ;;  %5214 = vrcp.f32 %v2137_v6  ;;  %4952 = vmatmul.mubr.msk.bf16.vlgmr.msra.gmra.mrb[116].mxu1 %vm256_vm2, %v2246_v19 }
 0x486   :  { %4962 = vmatpush3.bf16.msra.mxu1 %v3462_v36  ;;  %4957 = vmatprep.mubr.msk.bf16.mxu0 %vm5357_vm1, %v6713_v4 }
 0x487   :  { %4967 = vmatprep.subr.bf16.mxu0 %v6713_v4  ;;  %4963 = vmatprep.mubr.msk.bf16.mxu1 %vm5357_vm1, %v6713_v4 }
 0x488   :  { %v2140_v29 = vpop.xlane.xlu0 %2139  ;;  %4973 = vmatprep.subr.bf16.mxu1 %v6713_v4 }
 0x489   :  { %5216 = vrcp.f32 %v2140_v29 }
 0x48c   :  { %v2143_v61 = vpop.xlane.xlu1 %2142 }
 0x48d   :  { %5218 = vrcp.f32 %v2143_v61 }
 0x48f   :  { %v5215_v45 = vpop.eup %5214 }
 0x490   :  { %v2215_v52 = vmul.f32 %v5215_v45, %v6330_v22  ;;  %v2146_v47 = vpop.xlane.xlu0 %2145  ;;  %v6725_v22 = vld [vmem:[#allocation22_spill] sm:$0xff]  ;;  %v3649_v8 = vpop.permute.xlu1 %3648 }
 0x491   :  { %5220 = vrcp.f32 %v2146_v47  ;;  %v3558_v14 = vsel %vm2260_vm3, %v6725_v22, 0  ;;  %v3654_v60 = vsel %vm2260_vm3, %v3649_v8, 0 }
 0x492   :  { %v2247_v50 = vpack.c.bf16 %v2215_v52, %v2215_v52 }
 0x493   :  { %v5217_v32 = vpop.eup %5216 }
 0x494   :  { %v2216_v17 = vmul.f32 %v5217_v32, %v6334_v59  ;;  %4958 = vmatmul.mubr.msk.bf16.vlgmr.msra.gmra.mrb[112].mxu0 %vm256_vm2, %v2247_v50  ;;  %v3601_v26 = vpop.permute.xlu0 %3600 }
 0x495   :  { %4968 = vmatpush3.bf16.msra.mxu0 %v3510_v15  ;;  %4969 = vmatprep.mubr.msk.bf16.mxu0 %vm5357_vm1, %v6713_v4  ;;  %v3606_v7 = vsel %vm2260_vm3, %v3601_v26, 0 }
 0x496   :  { %v2248_v51 = vpack.c.bf16 %v2216_v17, %v2216_v17  ;;  %4979 = vmatprep.subr.bf16.mxu0 %v6713_v4 }
 0x497   :  { %v5219_v13 = vpop.eup %5218 }
 0x498   :  { %v2217_v5 = vmul.f32 %v5219_v13, %v6339_v54  ;;  %4964 = vmatmul.mubr.msk.bf16.vlgmr.msra.gmra.mrb[120].mxu1 %vm256_vm2, %v2248_v51 }
 0x499   :  { %4974 = vmatpush3.bf16.msra.mxu1 %v3558_v14  ;;  %4975 = vmatprep.mubr.msk.bf16.mxu1 %vm5357_vm1, %v6713_v4 }
 0x49a   :  { %v2249_v59 = vpack.c.bf16 %v2217_v5, %v2217_v5  ;;  %4985 = vmatprep.subr.bf16.mxu1 %v6713_v4 }
 0x49b   :  { %v5221_v42 = vpop.eup %5220 }
 0x49c   :  { %v2218_v20 = vmul.f32 %v5221_v42, %v6348_v9  ;;  %4970 = vmatmul.mubr.msk.bf16.vlgmr.msra.gmra.mrb[116].mxu0 %vm256_vm2, %v2249_v59 }
 0x49d   :  { %4980 = vmatpush3.bf16.msra.mxu0 %v3606_v7  ;;  %4981 = vmatprep.mubr.msk.bf16.mxu0 %vm5357_vm1, %v6713_v4 }
 0x49e   :  { %v2250_v54 = vpack.c.bf16 %v2218_v20, %v2218_v20  ;;  %4991 = vmatprep.subr.bf16.mxu0 %v6713_v4 }
 0x4a0   :  { %4976 = vmatmul.mubr.msk.bf16.vlgmr.msra.gmra.mrb[124].mxu1 %vm256_vm2, %v2250_v54 }
 0x4a1   :  { %4986 = vmatpush3.bf16.msra.mxu1 %v3654_v60  ;;  %4987 = vmatprep.mubr.msk.bf16.mxu1 %vm5357_vm1, %v6713_v4 }
 0x4a2   :  { %4997 = vmatprep.subr.bf16.mxu1 %v6713_v4 }
 0x4ab   :  { %v6522_v9 = vpop.f32.mrb[72].mxu1 }
 0x4ac   :  { %v4821_v35 = vpop.f32.mrb[73].mxu1 }
 0x4ad   :  { %v6524_v41 = vpop.f32.mrb[64].mxu0  ;;  %v2349_v53 = vpop.f32.mrb[74].mxu1 }
 0x4ae   :  { %v4815_v24 = vpop.f32.mrb[65].mxu0  ;;  %v4822_v40 = vpop.f32.mrb[75].mxu1 }
 0x4af   :  { %v2301_v44 = vpop.f32.mrb[66].mxu0 }
 0x4b0   :  { %v4816_v43 = vpop.f32.mrb[67].mxu0 }
 0x4b3   :  { %v6526_v55 = vpop.f32.mrb[76].mxu1 }
 0x4b4   :  { %v4833_v0 = vpop.f32.mrb[77].mxu1 }
 0x4b5   :  { %v6528_v46 = vpop.f32.mrb[68].mxu0  ;;  %v2445_v2 = vpop.f32.mrb[78].mxu1 }
 0x4b6   :  { %v4827_v63 = vpop.f32.mrb[69].mxu0  ;;  %v4834_v27 = vpop.f32.mrb[79].mxu1 }
 0x4b7   :  { %v2397_v21 = vpop.f32.mrb[70].mxu0 }
 0x4b8   :  { %v4828_v37 = vpop.f32.mrb[71].mxu0 }
 0x4bb   :  { %v6530_v12 = vpop.f32.mrb[80].mxu1 }
 0x4bc   :  { %v4845_v28 = vpop.f32.mrb[81].mxu1 }
 0x4bd   :  { %v6532_v56 = vpop.f32.mrb[72].mxu0  ;;  %v2541_v30 = vpop.f32.mrb[82].mxu1 }
 0x4be   :  { %v4839_v57 = vpop.f32.mrb[73].mxu0  ;;  %v4846_v25 = vpop.f32.mrb[83].mxu1 }
 0x4bf   :  { %v2493_v1 = vpop.f32.mrb[74].mxu0 }
 0x4c0   :  { %v4840_v58 = vpop.f32.mrb[75].mxu0 }
 0x4c1   :  { %v2149_v33 = vpop.xlane.xlu1 %2148 }
 0x4c2   :  { %5222 = vrcp.f32 %v2149_v33 }
 0x4c5   :  { %v6534_v48 = vpop.f32.mrb[76].mxu0  ;;  %v2155_v11 = vpop.xlane.xlu1 %2154 }
 0x4c6   :  { %5224 = vrcp.f32 %v2155_v11  ;;  %v2152_v3 = vpop.xlane.xlu0 %2151  ;;  %v4851_v18 = vpop.f32.mrb[77].mxu0 }
 0x4c7   :  { %5226 = vrcp.f32 %v2152_v3  ;;  %v2589_v16 = vpop.f32.mrb[78].mxu0 }
 0x4c8   :  { %v4852_v19 = vpop.f32.mrb[79].mxu0 }
 0x4c9   :  { %v3745_v32 = vpop.permute.xlu1 %3744 }
 0x4ca   :  { %v2158_v49 = vpop.xlane.xlu0 %2157  ;;  %v3750_v13 = vsel %vm2260_vm3, %v3745_v32, 0 }
 0x4cb   :  { %5228 = vrcp.f32 %v2158_v49 }
 0x4cc   :  { %v5223_v10 = vpop.eup %5222 }
 0x4cd   :  { %v2219_v6 = vmul.f32 %v5223_v10, %v6401_v62 }
 0x4ce   :  { %v3697_v23 = vpop.permute.xlu0 %3696 }
 0x4cf   :  { %v2251_v36 = vpack.c.bf16 %v2219_v6, %v2219_v6  ;;  %v3702_v45 = vsel %vm2260_vm3, %v3697_v23, 0 }
 0x4d0   :  { %v5225_v29 = vpop.eup %5224 }
 0x4d1   :  { %v5227_v61 = vpop.eup %5226  ;;  %4982 = vmatmul.mubr.msk.bf16.vlgmr.msra.gmra.mrb[120].mxu0 %vm256_vm2, %v2251_v36  ;;  %v2221_v50 = vmul.f32 %v5225_v29, %v6415_v39 }
 0x4d2   :  { %v2220_v52 = vmul.f32 %v5227_v61, %v6417_v38  ;;  %v6540_v47 = vpop.f32.mrb[84].mxu1  ;;  %4992 = vmatpush3.bf16.msra.mxu0 %v3702_v45  ;;  %4993 = vmatprep.mubr.msk.bf16.mxu0 %vm5357_vm1, %v6713_v4 }
 0x4d3   :  { %v4857_v62 = vpop.f32.mrb[85].mxu1  ;;  %v2253_v38 = vpack.c.bf16 %v2221_v50, %v2221_v50 }
 0x4d4   :  { %v2637_v34 = vpop.f32.mrb[86].mxu1  ;;  %v2252_v15 = vpack.c.bf16 %v2220_v52, %v2220_v52 }
 0x4d5   :  { %v5229_v17 = vpop.eup %5228  ;;  %v4858_v51 = vpop.f32.mrb[87].mxu1 }
 0x4d6   :  { %4988 = vmatmul.mubr.msk.bf16.vlgmr.msra.gmra.mrb[128].mxu1 %vm256_vm2, %v2252_v15  ;;  %v2222_v22 = vmul.f32 %v5229_v17, %v6429_v31 }
 0x4d7   :  { %4998 = vmatpush3.bf16.msra.mxu1 %v3750_v13  ;;  %4999 = vmatprep.mubr.msk.bf16.mxu1 %vm5357_vm1, %v6713_v4 }
 0x4d8   :  { %v2254_v39 = vpack.c.bf16 %v2222_v22, %v2222_v22 }
 0x4d9   :  { %4994 = vmatmul.mubr.msk.bf16.vlgmr.msra.gmra.mrb[124].mxu0 %vm256_vm2, %v2253_v38 }
 0x4de   :  { %5000 = vmatmul.mubr.msk.bf16.vlgmr.msra.gmra.mrb[132].mxu1 %vm256_vm2, %v2254_v39 }
 0x4ee   :  { %v2682_v14 = vpop.f32.mrb[80].mxu0 }
 0x4ef   :  { %v4863_v5 = vpop.f32.mrb[81].mxu0 }
 0x4f0   :  { %v2685_v26 = vpop.f32.mrb[82].mxu0 }
 0x4f1   :  { %v4864_v59 = vpop.f32.mrb[83].mxu0 }
 0x4f3   :  { %v2730_v42 = vpop.f32.mrb[88].mxu1 }
 0x4f4   :  { %v5038_v20 = vpack.i.bf16 %v2730_v42, %v2682_v14  ;;  %v4869_v7 = vpop.f32.mrb[89].mxu1 }
 0x4f5   :  { %v2733_v8 = vpop.f32.mrb[90].mxu1 }
 0x4f6   :  { %5039 = vrot.lane.b32.xlu0 %v5038_v20, %s5353_s25  ;;  %v4870_v54 = vpop.f32.mrb[91].mxu1  ;;  %v2778_v60 = vpop.f32.mrb[84].mxu0 }
 0x4f7   :  { %v4875_v4 = vpop.f32.mrb[85].mxu0 }
 0x4f8   :  { %v2781_v35 = vpop.f32.mrb[86].mxu0 }
 0x4f9   :  { %v4876_v31 = vpop.f32.mrb[87].mxu0 }
 0x4fb   :  { %v2826_v53 = vpop.f32.mrb[92].mxu1 }
 0x4fc   :  { %v5043_v24 = vpack.i.bf16 %v2826_v53, %v2778_v60  ;;  %v4881_v40 = vpop.f32.mrb[93].mxu1 }
 0x4fd   :  { %v2829_v44 = vpop.f32.mrb[94].mxu1 }
 0x4fe   :  { %5044 = vrot.lane.b32.xlu1 %v5043_v24, %s5353_s25  ;;  %v4882_v43 = vpop.f32.mrb[95].mxu1  ;;  %v2874_v0 = vpop.f32.mrb[88].mxu0 }
 0x4ff   :  { %v4887_v2 = vpop.f32.mrb[89].mxu0  ;;  %v5100_v43 = vld [vmem:[#allocation7] sm:$0xff]  }
 0x500   :  { %v2877_v63 = vpop.f32.mrb[90].mxu0  ;;  %5003 = vmatprep.subr.bf16.mxu0 %v5100_v43 }
 0x501   :  { %v4888_v27 = vpop.f32.mrb[91].mxu0  ;;  %5004 = vmatpush3.bf16.msra.mxu0 %v5100_v43 }
 0x503   :  { %v2922_v21 = vpop.f32.mrb[96].mxu1 }
 0x504   :  { %v5048_v37 = vpack.i.bf16 %v2922_v21, %v2874_v0  ;;  %v4893_v28 = vpop.f32.mrb[97].mxu1 }
 0x505   :  { %v2925_v30 = vpop.f32.mrb[98].mxu1  ;;  %v5101_v28 = vld [vmem:[#allocation7 + $0x8] sm:$0xff]  }
 0x506   :  { %5049 = vrot.lane.b32.xlu0 %v5048_v37, %s5353_s25  ;;  %v4894_v57 = vpop.f32.mrb[99].mxu1  ;;  %v2970_v25 = vpop.f32.mrb[92].mxu0  ;;  %5005 = vmatprep.subr.bf16.mxu0 %v5101_v28 }
 0x507   :  { %v4899_v1 = vpop.f32.mrb[93].mxu0  ;;  %5006 = vmatpush3.bf16.msra.mxu0 %v5101_v28 }
 0x508   :  { %v2973_v58 = vpop.f32.mrb[94].mxu0 }
 0x509   :  { %v4900_v33 = vpop.f32.mrb[95].mxu0 }
 0x50b   :  { %v3018_v11 = vpop.f32.mrb[100].mxu1 }
 0x50c   :  { %v5053_v3 = vpack.i.bf16 %v3018_v11, %v2970_v25  ;;  %v4905_v18 = vpop.f32.mrb[101].mxu1 }
 0x50d   :  { %v3021_v16 = vpop.f32.mrb[102].mxu1 }
 0x50e   :  { %5054 = vrot.lane.b32.xlu1 %v5053_v3, %s5353_s25  ;;  %v4906_v19 = vpop.f32.mrb[103].mxu1 }
 0x53f   :  { %v3066_v49 = vpop.f32.mrb[96].mxu0 }
 0x540   :  { %v3114_v10 = vpop.f32.mrb[104].mxu1  ;;  %v4911_v6 = vpop.f32.mrb[97].mxu0 }
 0x541   :  { %v5058_v23 = vpack.i.bf16 %v3114_v10, %v3066_v49  ;;  %v4917_v36 = vpop.f32.mrb[105].mxu1  ;;  %v3069_v29 = vpop.f32.mrb[98].mxu0 }
 0x542   :  { %v3117_v61 = vpop.f32.mrb[106].mxu1  ;;  %v4912_v45 = vpop.f32.mrb[99].mxu0 }
 0x543   :  { %5059 = vrot.lane.b32.xlu0 %v5058_v23, %s5361_s21  ;;  %v4918_v52 = vpop.f32.mrb[107].mxu1 }
 0x547   :  { %v3162_v50 = vpop.f32.mrb[100].mxu0 }
 0x548   :  { %v3210_v32 = vpop.f32.mrb[108].mxu1  ;;  %v4923_v62 = vpop.f32.mrb[101].mxu0 }
 0x549   :  { %v5063_v34 = vpack.i.bf16 %v3210_v32, %v3162_v50  ;;  %v4929_v15 = vpop.f32.mrb[109].mxu1  ;;  %v3165_v17 = vpop.f32.mrb[102].mxu0 }
 0x54a   :  { %v3213_v51 = vpop.f32.mrb[110].mxu1  ;;  %v4924_v13 = vpop.f32.mrb[103].mxu0 }
 0x54b   :  { %5064 = vrot.lane.b32.xlu1 %v5063_v34, %s5361_s21  ;;  %v4930_v38 = vpop.f32.mrb[111].mxu1 }
 0x54f   :  { %v3258_v22 = vpop.f32.mrb[104].mxu0 }
 0x550   :  { %v3306_v39 = vpop.f32.mrb[112].mxu1  ;;  %v4935_v14 = vpop.f32.mrb[105].mxu0 }
 0x551   :  { %v5073_v5 = vpack.i.bf16 %v3306_v39, %v3258_v22  ;;  %v4941_v26 = vpop.f32.mrb[113].mxu1  ;;  %v3261_v59 = vpop.f32.mrb[106].mxu0 }
 0x552   :  { %v3309_v42 = vpop.f32.mrb[114].mxu1  ;;  %v4936_v20 = vpop.f32.mrb[107].mxu0 }
 0x553   :  { %v4942_v7 = vpop.f32.mrb[115].mxu1 }
 0x557   :  { %v3354_v8 = vpop.f32.mrb[108].mxu0 }
 0x558   :  { %v3402_v54 = vpop.f32.mrb[116].mxu1  ;;  %v4947_v60 = vpop.f32.mrb[109].mxu0 }
 0x559   :  { %v5083_v4 = vpack.i.bf16 %v3402_v54, %v3354_v8  ;;  %v4953_v35 = vpop.f32.mrb[117].mxu1  ;;  %v3357_v31 = vpop.f32.mrb[110].mxu0 }
 0x55a   :  { %v3405_v53 = vpop.f32.mrb[118].mxu1  ;;  %v4948_v24 = vpop.f32.mrb[111].mxu0 }
 0x55b   :  { %v4954_v40 = vpop.f32.mrb[119].mxu1 }
 0x567   :  { %v3450_v44 = vpop.f32.mrb[112].mxu0 }
 0x568   :  { %v4959_v0 = vpop.f32.mrb[113].mxu0  ;;  %v5040_v3 = vpop.permute.xlu0 %5039 }
 0x569   :  { %v3453_v2 = vpop.f32.mrb[114].mxu0  ;;  %v5042_v8 = vunpack.i.h.bf16 %v5040_v3  ;;  %v5041_v54 = vunpack.i.l.bf16 %v5040_v3 }
 0x56a   :  { %v4960_v63 = vpop.f32.mrb[115].mxu0 }
 0x56b   :  { %v3498_v27 = vpop.f32.mrb[120].mxu1  ;;  %v3889_v31 = vsel %vm256_vm2, %v6522_v9, %v5042_v8  ;;  %v3888_v53 = vsel %vm256_vm2, %v6524_v41, %v5041_v54  ;;  %v5248_v54 = vld [vmem:[#allocation2 + $0x8] sm:$0xff] }
 0x56c   :  { %v5068_v21 = vpack.i.bf16 %v3498_v27, %v3450_v44  ;;  %v4965_v37 = vpop.f32.mrb[121].mxu1 }
 0x56d   :  { %v3501_v30 = vpop.f32.mrb[122].mxu1 }
 0x56e   :  { %5069 = vrot.lane.b32.xlu0 %v5068_v21, %s5362_s22  ;;  %v4966_v57 = vpop.f32.mrb[123].mxu1 }
 0x56f   :  { %v3546_v25 = vpop.f32.mrb[116].mxu0 }
 0x570   :  { %v4971_v1 = vpop.f32.mrb[117].mxu0  ;;  %v5045_v61 = vpop.permute.xlu1 %5044 }
 0x571   :  { %v3549_v58 = vpop.f32.mrb[118].mxu0  ;;  %v5047_v21 = vunpack.i.h.bf16 %v5045_v61  ;;  %v5046_v37 = vunpack.i.l.bf16 %v5045_v61 }
 0x572   :  { %v4972_v33 = vpop.f32.mrb[119].mxu0  ;;  %5074 = vrot.lane.b32.xlu0 %v5073_v5, %s5361_s21 }
 0x573   :  { %v3594_v11 = vpop.f32.mrb[124].mxu1  ;;  %v3891_v41 = vsel %vm256_vm2, %v6526_v55, %v5047_v21  ;;  %v3890_v57 = vsel %vm256_vm2, %v6528_v46, %v5046_v37 }
 0x574   :  { %v5078_v18 = vpack.i.bf16 %v3594_v11, %v3546_v25  ;;  %v4977_v16 = vpop.f32.mrb[125].mxu1 }
 0x575   :  { %v3597_v19 = vpop.f32.mrb[126].mxu1 }
 0x576   :  { %5079 = vrot.lane.b32.xlu1 %v5078_v18, %s5362_s22  ;;  %v4978_v49 = vpop.f32.mrb[127].mxu1 }
 0x578   :  { %v5050_v10 = vpop.permute.xlu0 %5049 }
 0x579   :  { %v5052_v6 = vunpack.i.h.bf16 %v5050_v10  ;;  %v5051_v23 = vunpack.i.l.bf16 %v5050_v10 }
 0x57a   :  { %5084 = vrot.lane.b32.xlu1 %v5083_v4, %s5361_s21 }
 0x57b   :  { %v6564_v36 = vsel %vm256_vm2, %v6530_v12, %v5052_v6  ;;  %v6568_v29 = vsel %vm256_vm2, %v6532_v56, %v5051_v23 }
 0x580   :  { %v5055_v45 = vpop.permute.xlu1 %5054 }
 0x581   :  { %v5057_v52 = vunpack.i.h.bf16 %v5055_v45  ;;  %v5056_v50 = vunpack.i.l.bf16 %v5055_v45 }
 0x583   :  { %v3895_v32 = vsel %vm256_vm2, %v6540_v47, %v5057_v52  ;;  %v3894_v62 = vsel %vm256_vm2, %v6534_v48, %v5056_v50 }
 0x5a4   :  { %v3642_v34 = vpop.f32.mrb[120].mxu0 }
 0x5a5   :  { %v4983_v15 = vpop.f32.mrb[121].mxu0 }
 0x5a6   :  { %v3645_v17 = vpop.f32.mrb[122].mxu0 }
 0x5a7   :  { %v4984_v51 = vpop.f32.mrb[123].mxu0 }
 0x5a9   :  { %v3690_v12 = vpop.f32.mrb[128].mxu1 }
 0x5aa   :  { %v5088_v13 = vpack.i.bf16 %v3690_v12, %v3642_v34  ;;  %v4989_v38 = vpop.f32.mrb[129].mxu1 }
 0x5ab   :  { %v3693_v22 = vpop.f32.mrb[130].mxu1 }
 0x5ac   :  { %5089 = vrot.lane.b32.xlu0 %v5088_v13, %s5362_s22  ;;  %v4990_v56 = vpop.f32.mrb[131].mxu1  ;;  %v3738_v39 = vpop.f32.mrb[124].mxu0 }
 0x5ad   :  { %v4995_v14 = vpop.f32.mrb[125].mxu0 }
 0x5ae   :  { %v3741_v5 = vpop.f32.mrb[126].mxu0 }
 0x5af   :  { %v4996_v26 = vpop.f32.mrb[127].mxu0 }
 0x5b0   :  { %v5246_v26 = vld [vmem:[#allocation2 + $0x10] sm:$0xff] }
 0x5b1   :  { %v3786_v59 = vpop.f32.mrb[132].mxu1 }
 0x5b2   :  { %v5093_v47 = vpack.i.bf16 %v3786_v59, %v3738_v39  ;;  %v5001_v42 = vpop.f32.mrb[133].mxu1 }
 0x5b3   :  { %v3789_v20 = vpop.f32.mrb[134].mxu1 }
 0x5b4   :  { %v5002_v48 = vpop.f32.mrb[135].mxu1  ;;  %5094 = vrot.lane.b32.xlu1 %v5093_v47, %s5362_s22  ;;  %v5247_v20 = vld [vmem:[#allocation2] sm:$0xff] }
 0x5b5   :  { %v5060_v7 = vpop.permute.xlu0 %5059 }
 0x5b6   :  { %v5062_v60 = vunpack.i.h.bf16 %v5060_v7  ;;  %v5061_v4 = vunpack.i.l.bf16 %v5060_v7 }
 0x5b8   :  { %v3897_v44 = vsel %vm3896_vm4, %v3888_v53, %v5061_v4  ;;  %v3898_v43 = vsel %vm3896_vm4, %v3889_v31, %v5062_v60 }
 0x5bd   :  { %v5065_v0 = vpop.permute.xlu1 %5064 }
 0x5be   :  { %v5067_v28 = vunpack.i.h.bf16 %v5065_v0  ;;  %v5066_v30 = vunpack.i.l.bf16 %v5065_v0 }
 0x5c0   :  { %v3900_v58 = vsel %vm3896_vm4, %v3891_v41, %v5067_v28  ;;  %v3899_v33 = vsel %vm3896_vm4, %v3890_v57, %v5066_v30  ;;  %v5251_v30 = vld [vmem:[#allocation2 + $0x30] sm:$0xff]  ;;  %v5252_v41 = vld [vmem:[#allocation2 + $0x28] sm:$0xff] }
 0x5e0   :  { %v5070_v35 = vpop.permute.xlu0 %5069 }
 0x5e1   :  { %v5072_v24 = vunpack.i.h.bf16 %v5070_v35  ;;  %v5071_v40 = vunpack.i.l.bf16 %v5070_v35  ;;  %v5249_v35 = vld [vmem:[#allocation2 + $0x18] sm:$0xff] }
 0x5e3   :  { %v3906_v2 = vsel %vm3905_vm5, %v3897_v44, %v5071_v40  ;;  %v3907_v63 = vsel %vm3905_vm5, %v3898_v43, %v5072_v24 }
 0x5e4   :  { %v3914_v27 = vpack.c.bf16 %v3907_v63, %v3906_v2  ;;  %v5075_v10 = vpop.permute.xlu0 %5074 }
 0x5e5   :  { %v5077_v6 = vunpack.i.h.bf16 %v5075_v10  ;;  %v5076_v23 = vunpack.i.l.bf16 %v5075_v10 }
 0x5e6   :  { %5007 = vmatprep.mubr.msk.bf16.mxu0 %vm104_vm0, %v3914_v27  ;;  %v5250_v27 = vld [vmem:[#allocation2 + $0x20] sm:$0xff] }
 0x5e7   :  { %v3901_v50 = vsel %vm3896_vm4, %v6568_v29, %v5076_v23  ;;  %v3902_v34 = vsel %vm3896_vm4, %v6564_v36, %v5077_v6  ;;  %v4450_v36 = vld [vmem:[%s6693_s4] ss:$0 sm:$0xff] }
 0x5e8   :  { %v5080_v9 = vpop.permute.xlu1 %5079 }
 0x5e9   :  { %v5082_v25 = vunpack.i.h.bf16 %v5080_v9  ;;  %v5081_v1 = vunpack.i.l.bf16 %v5080_v9 }
 0x5eb   :  { %v3909_v11 = vsel %vm3905_vm5, %v3900_v58, %v5082_v25  ;;  %v3908_v3 = vsel %vm3905_vm5, %v3899_v33, %v5081_v1  ;;  %v5253_v1 = vld [vmem:[#allocation2 + $0x38] sm:$0xff] }
 0x5ec   :  { %v3915_v18 = vpack.c.bf16 %v3909_v11, %v3908_v3  ;;  %v5085_v16 = vpop.permute.xlu1 %5084 }
 0x5ed   :  { %v5087_v19 = vunpack.i.h.bf16 %v5085_v16  ;;  %v5086_v49 = vunpack.i.l.bf16 %v5085_v16 }
 0x5ee   :  { %5008 = vmatmul.mubr.msk.bf16.vlgmr.msra.gmra.mrb[128].mxu0 %vm104_vm0, %v3915_v18 }
 0x5ef   :  { %v3904_v55 = vsel %vm3896_vm4, %v3895_v32, %v5087_v19  ;;  %v3903_v46 = vsel %vm3896_vm4, %v3894_v62, %v5086_v49 }
 0x61e   :  { %v5090_v61 = vpop.permute.xlu0 %5089 }
 0x61f   :  { %v5092_v45 = vunpack.i.h.bf16 %v5090_v61  ;;  %v5091_v52 = vunpack.i.l.bf16 %v5090_v61 }
 0x621   :  { %v3910_v15 = vsel %vm3905_vm5, %v3901_v50, %v5091_v52  ;;  %v3911_v17 = vsel %vm3905_vm5, %v3902_v34, %v5092_v45 }
 0x622   :  { %v3916_v51 = vpack.c.bf16 %v3911_v17, %v3910_v15 }
 0x624   :  { %5011 = vmatprep.mubr.msk.bf16.mxu0 %vm104_vm0, %v3916_v51 }
 0x626   :  { %v5095_v32 = vpop.permute.xlu1 %5094 }
 0x627   :  { %v5097_v62 = vunpack.i.h.bf16 %v5095_v32  ;;  %v5096_v12 = vunpack.i.l.bf16 %v5095_v32 }
 0x629   :  { %v3913_v13 = vsel %vm3905_vm5, %v3904_v55, %v5097_v62  ;;  %v3912_v38 = vsel %vm3905_vm5, %v3903_v46, %v5096_v12 }
 0x62a   :  { %v3917_v22 = vpack.c.bf16 %v3913_v13, %v3912_v38 }
 0x62c   :  { %5012 = vmatmul.mubr.msk.bf16.gmra.mrb[132].mxu0 %vm104_vm0, %v3917_v22 }
 0x6c1   :  { %v5009_v29 = vpop.f32.mrb[128].mxu0 }
 0x6c2   :  { %v3996_v56 = vadd.f32 %v5009_v29, %v4450_v36  ;;  %v3987_v39 = vpop.f32.mrb[129].mxu0 }
 0x6c3   :  { %v3988_v14 = vadd.f32 %v4450_v36, %v3987_v39  ;;  %v5010_v5 = vpop.f32.mrb[130].mxu0 }
 0x6c4   :  { %v4020_v59 = vadd.f32 %v5246_v26, %v3996_v56  ;;  %v3990_v47 = vpop.f32.mrb[131].mxu0  ;;  %v3999_v7 = vadd.f32 %v5010_v5, %v4450_v36 }
 0x6c5   :  { %v3991_v42 = vadd.f32 %v4450_v36, %v3990_v47  ;;  %v4018_v48 = vadd.f32 %v5247_v20, %v3988_v14 }
 0x6c6   :  { %v4032_v8 = vsel %vm104_vm0, %v4020_v59, 0.0  ;;  %v4021_v31 = vadd.f32 %v5249_v35, %v3999_v7 }
 0x6c7   :  { %v4019_v60 = vadd.f32 %v5248_v54, %v3991_v42  ;;  %4033 = vadd.xlane.f32.xlu0 %v4032_v8  ;;  %v4026_v53 = vsel %vm104_vm0, %v4018_v48, 0.0 }
 0x6c8   :  { %v4035_v24 = vsel %vm104_vm0, %v4021_v31, 0.0 }
 0x6c9   :  { %v4029_v4 = vsel %vm104_vm0, %v4019_v60, 0.0 }
 0x6ca   :  { %4030 = vadd.xlane.f32.xlu1 %v4029_v4 }
 0x6cb   :  { %4027 = vadd.xlane.f32.xlu0 %v4026_v53 }
 0x6cf   :  { %4036 = vadd.xlane.f32.xlu0 %v4035_v24 }
 0x6ff   :  { %v5013_v40 = vpop.f32.mrb[132].mxu0 }
 0x700   :  { %v4003_v44 = vpop.f32.mrb[133].mxu0  ;;  %v4012_v43 = vadd.f32 %v5013_v40, %v4450_v36 }
 0x701   :  { %v4004_v0 = vadd.f32 %v4450_v36, %v4003_v44  ;;  %v5014_v2 = vpop.f32.mrb[134].mxu0 }
 0x702   :  { %v4006_v63 = vpop.f32.mrb[135].mxu0  ;;  %v4015_v37 = vadd.f32 %v5014_v2, %v4450_v36  ;;  %v4024_v9 = vadd.f32 %v5251_v30, %v4012_v43 }
 0x703   :  { %v4022_v21 = vadd.f32 %v5250_v27, %v4004_v0  ;;  %v4007_v28 = vadd.f32 %v4450_v36, %v4006_v63 }
 0x704   :  { %v4025_v58 = vadd.f32 %v5253_v1, %v4015_v37  ;;  %v4044_v11 = vsel %vm104_vm0, %v4024_v9, 0.0 }
 0x705   :  { %v4023_v57 = vadd.f32 %v5252_v41, %v4007_v28  ;;  %v4038_v25 = vsel %vm104_vm0, %v4022_v21, 0.0 }
 0x706   :  { %4039 = vadd.xlane.f32.xlu1 %v4038_v25  ;;  %v4047_v3 = vsel %vm104_vm0, %v4025_v58, 0.0 }
 0x707   :  { %v4041_v33 = vsel %vm104_vm0, %v4023_v57, 0.0 }
 0x708   :  { %4042 = vadd.xlane.f32.xlu0 %v4041_v33 }
 0x70a   :  { %4045 = vadd.xlane.f32.xlu1 %v4044_v11 }
 0x70c   :  { %4048 = vadd.xlane.f32.xlu0 %v4047_v3 }
 0x754   :  { %v4034_v18 = vpop.xlane.xlu0 %4033 }
 0x755   :  { %v4053_v16 = vmul.f32 0.03125, %v4034_v18 }
 0x757   :  { %v6617_v19 = vsub.f32 %v4020_v59, %v4053_v16  ;;  %v4031_v49 = vpop.xlane.xlu1 %4030 }
 0x758   :  { %v4028_v55 = vpop.xlane.xlu0 %4027  ;;  %v4052_v6 = vmul.f32 0.03125, %v4031_v49 }
 0x759   :  { %v4051_v46 = vmul.f32 0.03125, %v4028_v55  ;;  %v4069_v10 = vmul.f32 %v6617_v19, %v6617_v19 }
 0x75a   :  { %v6626_v34 = vsub.f32 %v4019_v60, %v4052_v6 }
 0x75b   :  { %v6621_v23 = vsub.f32 %v4018_v48, %v4051_v46  ;;  %v4081_v61 = vsel %vm104_vm0, %v4069_v10, 0.0 }
 0x75c   :  { %4082 = vadd.xlane.f32.xlu1 %v4081_v61  ;;  %v4037_v45 = vpop.xlane.xlu0 %4036  ;;  %v4068_v62 = vmul.f32 %v6626_v34, %v6626_v34  ;;  %v4457_v61 = vld [vmem:[%s6694_s5] ss:$0 sm:$0xff]  ;;  %s5365_s5 = smov 32  }
 0x75d   :  { %v4054_v52 = vmul.f32 0.03125, %v4037_v45  ;;  %v4067_v50 = vmul.f32 %v6621_v23, %v6621_v23 }
 0x75e   :  { %v4078_v12 = vsel %vm104_vm0, %v4068_v62, 0.0  ;;  %v4166_v62 = vlaneseq }
 0x75f   :  { %v6628_v15 = vsub.f32 %v4021_v31, %v4054_v52  ;;  %v4075_v17 = vsel %vm104_vm0, %v4067_v50, 0.0 }
 0x760   :  { %4076 = vadd.xlane.f32.xlu1 %v4075_v17 }
 0x761   :  { %v4070_v51 = vmul.f32 %v6628_v15, %v6628_v15 }
 0x763   :  { %v4084_v32 = vsel %vm104_vm0, %v4070_v51, 0.0 }
 0x764   :  { %4085 = vadd.xlane.f32.xlu0 %v4084_v32  ;;  %v5363_v32 = vmov 1983009808  }
 0x768   :  { %4079 = vadd.xlane.f32.xlu0 %v4078_v12 }
 0x793   :  { %v4040_v13 = vpop.xlane.xlu1 %4039 }
 0x794   :  { %v4055_v38 = vmul.f32 0.03125, %v4040_v13 }
 0x795   :  { %v4043_v22 = vpop.xlane.xlu0 %4042 }
 0x796   :  { %v6637_v36 = vsub.f32 %v4022_v21, %v4055_v38  ;;  %v4056_v29 = vmul.f32 0.03125, %v4043_v22 }
 0x797   :  { %v4046_v56 = vpop.xlane.xlu1 %4045 }
 0x798   :  { %v6639_v39 = vsub.f32 %v4023_v57, %v4056_v29  ;;  %v4057_v14 = vmul.f32 0.03125, %v4046_v56  ;;  %v4071_v5 = vmul.f32 %v6637_v36, %v6637_v36 }
 0x799   :  { %v4049_v26 = vpop.xlane.xlu0 %4048 }
 0x79a   :  { %v6643_v59 = vsub.f32 %v4024_v9, %v4057_v14  ;;  %v4058_v47 = vmul.f32 0.03125, %v4049_v26  ;;  %v4087_v42 = vsel %vm104_vm0, %v4071_v5, 0.0  ;;  %v4072_v20 = vmul.f32 %v6639_v39, %v6639_v39 }
 0x79b   :  { %4088 = vadd.xlane.f32.xlu1 %v4087_v42  ;;  %v4167_v5 = vshrl.u32 %v4166_v62, 7 }
 0x79c   :  { %v6648_v48 = vsub.f32 %v4025_v58, %v4058_v47  ;;  %v4090_v7 = vsel %vm104_vm0, %v4072_v20, 0.0  ;;  %v4073_v8 = vmul.f32 %v6643_v59, %v6643_v59 }
 0x79d   :  { %4091 = vadd.xlane.f32.xlu0 %v4090_v7 }
 0x79e   :  { %v4093_v54 = vsel %vm104_vm0, %v4073_v8, 0.0  ;;  %v4074_v60 = vmul.f32 %v6648_v48, %v6648_v48  ;;  %v5364_v8 = vmov 1934713408  }
 0x79f   :  { %4094 = vadd.xlane.f32.xlu1 %v4093_v54  ;;  %v4228_v54 = vunpack.c.l.s4 %v5364_v8 }
 0x7a0   :  { %v4096_v4 = vsel %vm104_vm0, %v4074_v60, 0.0 }
 0x7a1   :  { %4097 = vadd.xlane.f32.xlu0 %v4096_v4 }
 0x7e9   :  { %v4083_v31 = vpop.xlane.xlu1 %4082 }
 0x7ea   :  { %v4101_v0 = vmul.f32 0.03125, %v4083_v31 }
 0x7ec   :  { %v4109_v21 = vadd.f32 1e-12, %v4101_v0  ;;  %v4229_v0 = vunpack.c.0.s8 %v4228_v54 }
 0x7ed   :  { %v4077_v24 = vpop.xlane.xlu1 %4076 }
 0x7ee   :  { %v4099_v44 = vmul.f32 0.03125, %v4077_v24 }
 0x7f0   :  { %v4107_v63 = vadd.f32 1e-12, %v4099_v44 }
 0x7f1   :  { %v4086_v35 = vpop.xlane.xlu0 %4085 }
 0x7f2   :  { %v4102_v43 = vmul.f32 0.03125, %v4086_v35 }
 0x7f4   :  { %v4110_v27 = vadd.f32 1e-12, %v4102_v43 }
 0x7f5   :  { %v4080_v53 = vpop.xlane.xlu0 %4079 }
 0x7f6   :  { %v4100_v40 = vmul.f32 0.03125, %v4080_v53 }
 0x7f8   :  { %v4108_v2 = vadd.f32 1e-12, %v4100_v40 }
 0x7fa   :  { %5230 = vrsqrt.f32 %v4108_v2 }
 0x7fb   :  { %5232 = vrsqrt.f32 %v4107_v63 }
 0x7fc   :  { %5234 = vrsqrt.f32 %v4110_v27 }
 0x7fd   :  { %5236 = vrsqrt.f32 %v4109_v21 }
 0x804   :  { %v5231_v58 = vpop.eup %5230 }
 0x805   :  { %v5233_v11 = vpop.eup %5232  ;;  %v4124_v49 = vmul.f32 %v5231_v58, %v6626_v34  ;;  %v4164_v34 = vunpack.c.l.s4 %v5363_v32 }
 0x806   :  { %v5235_v16 = vpop.eup %5234  ;;  %v4123_v10 = vmul.f32 %v5233_v11, %v6621_v23  ;;  %v4458_v23 = vld [vmem:[%s6695_s6] ss:$0 sm:$0xff]  ;;  %s5366_s6 = smov [#allocation8]  }
 0x807   :  { %v5237_v46 = vpop.eup %5236  ;;  %v4126_v6 = vmul.f32 %v5235_v16, %v6628_v15  ;;  %v4139_v52 = vmul.f32 %v4457_v61, %v4124_v49  ;;  %v4165_v14 = vunpack.c.0.s8 %v4164_v34  ;;  %s4337_s27 = sshll.u32 %s5366_s6, 4  ;;  %s4338_s27 = int_to_ptr.vmem [resolvable:$true] %s4337_s27 }
 0x808   :  { %v4125_v45 = vmul.f32 %v5237_v46, %v6617_v19  ;;  %v4138_v17 = vmul.f32 %v4457_v61, %v4123_v10  ;;  %p5325_p11 = scmp.lt.s32.totalorder %s4338_s27, %s4338_s27 }
 0x809   :  { %v4141_v51 = vmul.f32 %v4457_v61, %v4126_v6  ;;  %v4154_v38 = vadd.f32 %v4458_v23, %v4139_v52 }
 0x80a   :  { %v4140_v13 = vmul.f32 %v4457_v61, %v4125_v45  ;;  %v4153_v19 = vadd.f32 %v4458_v23, %v4138_v17 }
 0x80b   :  { %v4156_v56 = vadd.f32 %v4458_v23, %v4141_v51 }
 0x80c   :  { %v4155_v20 = vadd.f32 %v4458_v23, %v4140_v13 }
 0x80d   :  { %v4178_v7 = vcombine.high %v4154_v38, %v4156_v56  ;;  %v4177_v60 = vcombine.low %v4154_v38, %v4156_v56 }
 0x80e   :  { %v4162_v31 = vcombine.high %v4153_v19, %v4155_v20  ;;  %v4161_v53 = vcombine.low %v4153_v19, %v4155_v20 }
 0x828   :  { %v4089_v37 = vpop.xlane.xlu1 %4088 }
 0x829   :  { %v4103_v28 = vmul.f32 0.03125, %v4089_v37 }
 0x82a   :  { %v4092_v30 = vpop.xlane.xlu0 %4091 }
 0x82b   :  { %v4111_v9 = vadd.f32 1e-12, %v4103_v28  ;;  %v4104_v41 = vmul.f32 0.03125, %v4092_v30 }
 0x82c   :  { %v4095_v57 = vpop.xlane.xlu1 %4094 }
 0x82d   :  { %5238 = vrsqrt.f32 %v4111_v9  ;;  %v4112_v25 = vadd.f32 1e-12, %v4104_v41  ;;  %v4105_v1 = vmul.f32 0.03125, %v4095_v57  ;;  %v4232_v41 = vsub.s32 %v4229_v0, %v4167_v5 }
 0x82e   :  { %v4098_v33 = vpop.xlane.xlu0 %4097 }
 0x82f   :  { %5240 = vrsqrt.f32 %v4112_v25  ;;  %v4113_v3 = vadd.f32 1e-12, %v4105_v1  ;;  %v4106_v18 = vmul.f32 0.03125, %v4098_v33 }
 0x831   :  { %5242 = vrsqrt.f32 %v4113_v3  ;;  %v4114_v55 = vadd.f32 1e-12, %v4106_v18 }
 0x833   :  { %5244 = vrsqrt.f32 %v4114_v55 }
 0x837   :  { %v5239_v50 = vpop.eup %5238 }
 0x838   :  { %v4127_v15 = vmul.f32 %v5239_v50, %v6637_v36 }
 0x839   :  { %v5241_v12 = vpop.eup %5240 }
 0x83a   :  { %v4128_v22 = vmul.f32 %v5241_v12, %v6639_v39  ;;  %v4142_v26 = vmul.f32 %v4457_v61, %v4127_v15  ;;  %v4168_v39 = vsub.s32 %v4165_v14, %v4167_v5 }
 0x83b   :  { %v5243_v29 = vpop.eup %5242 }
 0x83c   :  { %v4129_v47 = vmul.f32 %v5243_v29, %v6643_v59  ;;  %v4143_v36 = vmul.f32 %v4457_v61, %v4128_v22  ;;  %v4157_v24 = vadd.f32 %v4458_v23, %v4142_v26  ;;  %v4192_v43 = vrot.slane %v4178_v7, %v4168_v39 }
 0x83d   :  { %v5245_v42 = vpop.eup %5244  ;;  %v4185_v2 = vrot.slane %v4177_v60, %v4168_v39  ;;  %v4176_v37 = vrot.slane %v4162_v31, %v4168_v39  ;;  %v4169_v28 = vrot.slane %v4161_v53, %v4168_v39 }
 0x83e   :  { %v4144_v4 = vmul.f32 %v4457_v61, %v4129_v47  ;;  %v4130_v35 = vmul.f32 %v5245_v42, %v6648_v48  ;;  %v4158_v59 = vadd.f32 %v4458_v23, %v4143_v36 }
 0x83f   :  { %v4241_v57 = vcombine.low %v4176_v37, %v4192_v43  ;;  %v4225_v48 = vcombine.low %v4169_v28, %v4185_v2  ;;  %v4226_v16 = vcombine.high %v4169_v28, %v4185_v2  ;;  %v4242_v32 = vcombine.high %v4176_v37, %v4192_v43 }
 0x840   :  { %v4159_v40 = vadd.f32 %v4458_v23, %v4144_v4  ;;  %v4145_v44 = vmul.f32 %v4457_v61, %v4130_v35 }
 0x841   :  { %v4249_v49 = vrot.slane %v4241_v57, %v4232_v41  ;;  %v4233_v46 = vrot.slane %v4225_v48, %v4232_v41  ;;  %v4240_v51 = vrot.slane %v4226_v16, %v4232_v41  ;;  %v4256_v15 = vrot.slane %v4242_v32, %v4232_v41 }
 0x842   :  { %v4160_v63 = vadd.f32 %v4458_v23, %v4145_v44  ;;  %v4194_v27 = vcombine.high %v4157_v24, %v4159_v40  ;;  %v4193_v21 = vcombine.low %v4157_v24, %v4159_v40 }
 0x844   :  { %v4210_v30 = vcombine.high %v4158_v59, %v4160_v63  ;;  %v4209_v9 = vcombine.low %v4158_v59, %v4160_v63  ;;  %v4208_v25 = vrot.slane %v4194_v27, %v4168_v39  ;;  %v4201_v58 = vrot.slane %v4193_v21, %v4168_v39 }
 0x846   :  { %v4224_v1 = vrot.slane %v4210_v30, %v4168_v39  ;;  %v4217_v33 = vrot.slane %v4209_v9, %v4168_v39 }
 0x848   :  { %v4273_v11 = vcombine.low %v4208_v25, %v4224_v1  ;;  %v4257_v3 = vcombine.low %v4201_v58, %v4217_v33  ;;  %v4258_v18 = vcombine.high %v4201_v58, %v4217_v33  ;;  %v4274_v52 = vcombine.high %v4208_v25, %v4224_v1 }
 0x84a   :  { %v4281_v55 = vrot.slane %v4273_v11, %v4232_v41  ;;  %v4265_v10 = vrot.slane %v4257_v3, %v4232_v41  ;;  %v4272_v45 = vrot.slane %v4258_v18, %v4232_v41  ;;  %v4288_v23 = vrot.slane %v4274_v52, %v4232_v41 }
 0x84c   :  { %v4294_v6 = vcombine.high %v4249_v49, %v4281_v55  ;;  %v4290_v61 = vcombine.high %v4233_v46, %v4265_v10  ;;  %v4293_v50 = vcombine.low %v4249_v49, %v4281_v55  ;;  %v4289_v17 = vcombine.low %v4233_v46, %v4265_v10 }
 0x84d   :  { %v4292_v34 = vcombine.high %v4240_v51, %v4272_v45  ;;  %v4291_v62 = vcombine.low %v4240_v51, %v4272_v45  ;;  %v4295_v12 = vcombine.low %v4256_v15, %v4288_v23  ;;  %v4296_v13 = vcombine.high %v4256_v15, %v4288_v23 }
 0x84e   :  { %4310 = vrot.lane.b32.xlu0 %v4294_v6, %s5365_s5  ;;  %4298 = vrot.lane.b32.xlu1 %v4290_v61, %s5365_s5 }
 0x852   :  { %4306 = vrot.lane.b32.xlu0 %v4292_v34, %s5358_s2  ;;  %4302 = vrot.lane.b32.xlu1 %v4291_v62, %s5349_s11 }
 0x856   :  { %4314 = vrot.lane.b32.xlu1 %v4295_v12, %s5349_s11  ;;  %s5320_s11 = scalar_lea.vmem %s4338_s27, 256 }
 0x857   :  { %p5321_p10 = scmp.ne.s32.totalorder %s4338_s27, %s5320_s11  ;;  %p5326_p12 = scmp.lt.s32.totalorder %s5320_s11, %s5320_s11 }
 0x859   :  { %p5327_p13 = por %p5326_p12, %p5325_p11 }
 0x85a   :  { %4318 = vrot.lane.b32.xlu1 %v4296_v13, %s5358_s2 }
 0x85b   :  { %p5328_p0 = pnand %p5327_p13, %p5321_p10 }
 0x8c0   :  { %v4311_v38 = vpop.permute.xlu0 %4310  ;;  %v4299_v22 = vpop.permute.xlu1 %4298 }
 0x8c1   :  { %v4321_v29 = vsel %vm104_vm0, %v4289_v17, %v4299_v22  ;;  %v4326_v47 = vsel %vm104_vm0, %v4293_v50, %v4311_v38 }
 0x8c4   :  { %v4307_v19 = vpop.permute.xlu0 %4306  ;;  %v4303_v56 = vpop.permute.xlu1 %4302 }
 0x8c5   :  { %v4323_v14 = vsel %vm4322_vm6, %v4321_v29, %v4303_v56 }
 0x8c6   :  { %v4325_v5 = vsel %vm4324_vm7, %v4323_v14, %v4307_v19 }
 0x8c7   :  { %4329 = vst [vmem:[#allocation8] sm:$0xff] %v4325_v5 }
 0x8c8   :  { %v4315_v26 = vpop.permute.xlu1 %4314 }
 0x8c9   :  { %v4327_v42 = vsel %vm4322_vm6, %v4326_v47, %v4315_v26 }
 0x8cc   :  { %v4319_v20 = vpop.permute.xlu1 %4318 }
 0x8cd   :  { %v4328_v7 = vsel %vm4324_vm7, %v4327_v42, %v4319_v20 }
 0x8ce   :  { %4330 = vst [vmem:[#allocation8 + $0x8] sm:$0xff] %v4328_v7 }
 0x8cf   :  { %5331 = shalt.err (!%p5328_p0)
}
 0x8d0   :  { %s5332_s30 = scalar_lea.hbm %s6696_s7, 256 }
 0x8d1   :  { %p5333_p1 = scmp.ne.s32.totalorder %s6696_s7, %s5332_s30  ;;  %p5336_p2 = scmp.lt.u32.totalorder %s5332_s30, %s6696_s7 }
 0x8d3   :  { %p5338_p3 = pnand %p5336_p2, %p5333_p1 }
 0x8d5   :  { %5341 = shalt.err (!%p5338_p3)
}
 0x8d6   :  { %4340 = dma.vmem_to_hbm [thread:$0]  %s4338_s27, 256, %s6696_s7, [#allocation4]  }
 0x8d7   :  { %5346 = dma.done.wait [#allocation4], 256  }
 0x8d8   :  { %5347 = vsyncadd [#allocation4], 4294967040 }
 0x8d9   :  { %4344 = vsyncpa [#allocation3], 1 }
 0x8da   :  { %4345 = vsyncpa [#allocation6], 1 }
 0x8db   :  { %4346 = vsyncpa [#allocation4], 1 }

</bundles_post_ra>
